<compile_context>
chip_gen: v5e
topology: v5e:2x2
jax: 0.10.0
libtpu: 0.0.40
codegen_flags: <defaults>
</compile_context>

<pallas_src>
from functools import partial

import jax
import jax.numpy as jnp
from jax import lax
from jax.experimental import pallas as pl
from jax.experimental.pallas import tpu as pltpu

LN_EPS = 1e-5


def _layernorm(x, g, b):
    # PyTorch nn.LayerNorm: biased variance, eps inside rsqrt.  f32 math.
    mu = jnp.mean(x, axis=-1, keepdims=True)
    var = jnp.mean((x - mu) ** 2, axis=-1, keepdims=True)
    return (x - mu) * lax.rsqrt(var + LN_EPS) * g + b


def _erf(x):
    # Abramowitz & Stegun 7.1.26 (max abs error ~1.5e-7).  Uses only exp/mul/add/div/where
    # so it lowers natively in Mosaic (no reliance on a lax.erf lowering rule).
    ax = jnp.where(x >= 0.0, x, -x)
    t = 1.0 / (1.0 + 0.3275911 * ax)
    poly = t * (0.254829592 + t * (-0.284496736 + t * (1.421413741
               + t * (-1.453152027 + t * 1.061405429))))
    y = 1.0 - poly * jnp.exp(-(ax * ax))
    return jnp.where(x >= 0.0, y, -y)


def _gelu(x):
    # PyTorch nn.GELU() default = exact erf formulation (f32 math, ~1e-7 poly erf).
    return 0.5 * x * (1.0 + _erf(x * jnp.float32(0.7071067811865476)))


def encoder_kernel(x_ref,
                   ln1_g_ref, ln1_b_ref, wq_ref, wk_ref, wv_ref, wo_ref, bo_ref,
                   ln2_g_ref, ln2_b_ref, w1_ref, b1_ref, w2_ref, b2_ref,
                   o_ref, x_acc_ref, attn_sc_ref, *, heads, matmul_dtype):
    """One grid step = one (batch-tile, layer) pair.  Grid = (B_tiles, depth).

    CORRECTNESS NOTE: the VMEM activation accumulator (x_acc_ref) is only valid because
    the layer axis is the innermost, sequentially executed ("arbitrary") grid axis and
    the output block index is constant across it.  Do not reorder the grid axes or mark
    the layer axis parallel / core_parallel.
    """
    layer = pl.program_id(1)
    n_layers = pl.num_programs(1)

    Bt, N, E = x_ref.shape
    rows = Bt * N
    D = E // heads
    scale = jnp.float32(D ** -0.5)

    # Load input activations into the layer-carried VMEM accumulator at layer 0.
    @pl.when(layer == 0)
    def _():
        x_acc_ref[...] = x_ref[...].reshape(rows, E).astype(jnp.float32)

    x = x_acc_ref[...]                                               # (rows, E) f32

    # ---- PreNorm + MultiHeadAttention (no mask / attn_bias, dropout = 0) ----
    xn = _layernorm(x, ln1_g_ref[0], ln1_b_ref[0]).astype(matmul_dtype)
    q = jnp.dot(xn, wq_ref[0], preferred_element_type=jnp.float32)   # (rows, E) f32
    k = jnp.dot(xn, wk_ref[0], preferred_element_type=jnp.float32)
    v = jnp.dot(xn, wv_ref[0], preferred_element_type=jnp.float32)
    qm = (q * scale).astype(matmul_dtype)   # fold 1/sqrt(D) into q: rows*E elems, not H*N*N
    km = k.astype(matmul_dtype)
    vm = v.astype(matmul_dtype)

    # Per-head static loop (H iterations, independent of Bt): every matmul is a single
    # leading-batch-dim einsum over the whole (Bt, N, .) slab; per-head outputs go
    # straight into the (rows, E) scratch slab at static lane offset h*D (no concat).
    for h in range(heads):
        cols = slice(h * D, (h + 1) * D)
        qh = qm[:, cols].reshape(Bt, N, D)
        kh = km[:, cols].reshape(Bt, N, D)
        vh = vm[:, cols].reshape(Bt, N, D)
        s = jnp.einsum('bnd,bmd->bnm', qh, kh,
                       preferred_element_type=jnp.float32)           # (Bt, N, N) f32
        s = s - jnp.max(s, axis=-1, keepdims=True)
        p = jnp.exp(s)
        l = jnp.sum(p, axis=-1, keepdims=True)                        # (Bt, N, 1)
        ob = jnp.einsum('bnm,bmd->bnd', p.astype(matmul_dtype), vh,
                        preferred_element_type=jnp.float32)           # (Bt, N, D) f32
        # Normalize AFTER the AV matmul: VALU pass over N*D elems instead of N*N.
        ob = ob * pl.reciprocal(l, approx=True)
        attn_sc_ref[:, cols] = ob.reshape(rows, D).astype(attn_sc_ref.dtype)
    # TODO(synk): for long sequences, tile the KV axis (online-softmax / flash) instead of
    # materializing the (Bt, N, N) score block per head.

    attn = jnp.dot(attn_sc_ref[...], wo_ref[0],
                   preferred_element_type=jnp.float32) + bo_ref[0]
    x = x + attn                                                     # residual 1 (f32)

    # ---- PreNorm + FeedForward ----
    xn2 = _layernorm(x, ln2_g_ref[0], ln2_b_ref[0]).astype(matmul_dtype)
    h1 = jnp.dot(xn2, w1_ref[0], preferred_element_type=jnp.float32) + b1_ref[0]
    h1 = _gelu(h1)
    h2 = jnp.dot(h1.astype(matmul_dtype), w2_ref[0],
                 preferred_element_type=jnp.float32) + b2_ref[0]
    x = x + h2                                                       # residual 2 (f32)

    x_acc_ref[...] = x                                               # carry to next layer

    @pl.when(layer == n_layers - 1)
    def _():
        o_ref[...] = x.reshape(Bt, N, E).astype(o_ref.dtype)


def transformer_encoder(x, params, heads, *,
                        matmul_dtype=jnp.bfloat16,
                        io_dtype=jnp.bfloat16,
                        block_b=None,
                        target_rows=512):
    """Runs the whole depth-layer encoder in a single pallas_call.

    params: tuple of arrays, each with a leading 'layer' axis (see init_params).
    Pass matmul_dtype=io_dtype=jnp.float32 for strict f32 parity with PyTorch.
    """
    B, N, E = x.shape
    (ln1_g, ln1_b, wq, wk, wv, wo, bo, ln2_g, ln2_b, w1, b1, w2, b2) = params
    depth = wq.shape[0]
    mlp = w1.shape[-1]

    # --- shape guards: lane-dense outputs & no silent sublane-merge copies ---
    assert E % heads == 0, "emb_dim must be divisible by heads"
    assert E % 128 == 0, "emb_dim must be a multiple of 128 (TPU lane width)"
    assert mlp % 128 == 0, "mlp_dim must be a multiple of 128 (TPU lane width)"
    io_dtype = jnp.dtype(io_dtype)
    sublane = 16 if io_dtype.itemsize == 2 else 8
    assert N % sublane == 0, f"seq_len must be a multiple of {sublane} for {io_dtype} IO"

    # Cast MXU weight operands once on the host (halves weight HBM->VMEM traffic); LN
    # params / biases stay f32 (added to f32 accumulators).
    if jnp.dtype(matmul_dtype) != jnp.dtype(jnp.float32):
        wq, wk, wv, wo, w1, w2 = (w.astype(matmul_dtype)
                                  for w in (wq, wk, wv, wo, w1, w2))
    params = (ln1_g, ln1_b, wq, wk, wv, wo, bo, ln2_g, ln2_b, w1, b1, w2, b2)

    # Activations cross the HBM boundary in io_dtype (bf16 by default); all in-kernel
    # LayerNorm / softmax / residual math and the carried accumulator stay f32.
    x = x.astype(io_dtype)

    # --- batch tile: many rows per weight fetch (arithmetic intensity on v5e/v6e), but
    # keep >= 2 batch tiles when cheap so the parallel axis can shard over v7x's 2 TCs ---
    if block_b is None:
        divisors = [d for d in range(1, B + 1) if B % d == 0]
        fitting = [d for d in divisors if d * N <= target_rows] or [1]
        block_b = max(fitting)
        if B // block_b < 2:
            two_tile = [d for d in fitting if B // d >= 2]
            if two_tile and (max(two_tile) * N >= 128 or block_b * N <= 128):
                block_b = max(two_tile)
    assert B % block_b == 0
    Bt = block_b
    rows = Bt * N
    grid = (B // Bt, depth)              # (parallel batch tiles, sequential layers)

    x_map = lambda b, l: (b, 0, 0)       # activations follow the batch-tile axis
    w_map = lambda b, l: (l, 0, 0)       # parameters follow the layer axis
    # TODO(synk): w_map ignores the batch index, so each layer's weights are re-fetched
    # B//Bt times; for small models keep all layers resident (memory_space=pl.ANY + one
    # manual DMA) — biggest win on v5e's 0.82 TB/s HBM.

    in_specs = [
        pl.BlockSpec((Bt, N, E), x_map),     # x
        pl.BlockSpec((1, 1, E), w_map),      # ln1_g
        pl.BlockSpec((1, 1, E), w_map),      # ln1_b
        pl.BlockSpec((1, E, E), w_map),      # wq
        pl.BlockSpec((1, E, E), w_map),      # wk
        pl.BlockSpec((1, E, E), w_map),      # wv
        pl.BlockSpec((1, E, E), w_map),      # wo
        pl.BlockSpec((1, 1, E), w_map),      # bo
        pl.BlockSpec((1, 1, E), w_map),      # ln2_g
        pl.BlockSpec((1, 1, E), w_map),      # ln2_b
        pl.BlockSpec((1, E, mlp), w_map),    # w1
        pl.BlockSpec((1, 1, mlp), w_map),    # b1
        pl.BlockSpec((1, mlp, E), w_map),    # w2
        pl.BlockSpec((1, 1, E), w_map),      # b2
    ]
    out_specs = pl.BlockSpec((Bt, N, E), x_map)

    # --- generation-aware VMEM budget (~78% of physical; v7x 64 MiB vs v5e/v6e 128 MiB) ---
    try:
        vmem_cap = int(pltpu.get_tpu_info().vmem_capacity_bytes)
    except Exception:
        vmem_cap = 64 << 20   # conservative fallback: v7x physical VMEM per TensorCore
    weight_tile = sum(int(p.size // depth) * p.dtype.itemsize for p in params)
    act_tile = rows * E * io_dtype.itemsize
    scratch = rows * E * 4 + rows * E * jnp.dtype(matmul_dtype).itemsize
    interm = rows * (3 * E + mlp) * 4 + Bt * N * N * 4   # q/k/v, h1, one head's scores
    est = 2 * (act_tile + weight_tile) + 2 * act_tile + scratch + interm + (4 << 20)
    vmem_limit = int(min(max(est, 32 << 20), int(vmem_cap * 0.78)))
    # TODO(synk): if 2x the per-layer weight slab no longer fits (very large E/mlp), split
    # the layer step into attention/FFN sub-steps or tile w1/w2 over the mlp dim.

    # Advisory cost estimate for XLA scheduling around the custom call.
    flops = depth * (2 * B * N * E * (4 * E + 2 * mlp) + 4 * B * N * N * E)
    transcendentals = depth * B * N * (heads * N + mlp + 2)
    bytes_accessed = (2 * B * N * E * io_dtype.itemsize
                      + (B // Bt) * depth * weight_tile)
    cost = pl.CostEstimate(flops=int(flops), transcendentals=int(transcendentals),
                           bytes_accessed=int(bytes_accessed))

    kernel = partial(encoder_kernel, heads=heads, matmul_dtype=matmul_dtype)
    return pl.pallas_call(
        kernel,
        out_shape=jax.ShapeDtypeStruct((B, N, E), io_dtype),
        grid_spec=pltpu.PrefetchScalarGridSpec(
            num_scalar_prefetch=0,
            grid=grid,
            in_specs=in_specs,
            out_specs=out_specs,
            scratch_shapes=[pltpu.VMEM((rows, E), jnp.float32),     # layer-carried acts
                            pltpu.VMEM((rows, E), matmul_dtype)],   # per-head attn slab
        ),
        compiler_params=pltpu.CompilerParams(
            # The layer axis MUST stay "arbitrary" (sequential, innermost) — the x_acc
            # carry depends on it.
            # TODO(synk): on v7x, consider pltpu.CORE_PARALLEL on axis 0 to force a 2-TC
            # split; plain "parallel" is kept for portability to single-TC v5e/v6e.
            dimension_semantics=("parallel", "arbitrary"),
            vmem_limit_bytes=vmem_limit,
        ),
        cost_estimate=cost,
    )(x, *params)


def init_params(key, depth, emb_dim, mlp_dim):
    """Deterministic init mimicking PyTorch defaults (U(-1/sqrt(fan_in), 1/sqrt(fan_in))).

    Returns a tuple of arrays, each stacked along a leading 'layer' axis so the whole
    depth loop runs inside one pallas_call.  The fused to_qkv weight is split into three
    lane-dense (E, E) matrices (wq, wk, wv).
    """
    def linear(k, fan_in, fan_out, bias=True):
        k_w, k_b = jax.random.split(k)
        bound = 1.0 / (fan_in ** 0.5)
        w = jax.random.uniform(k_w, (fan_in, fan_out), jnp.float32, -bound, bound)
        if not bias:
            return w, None
        b = jax.random.uniform(k_b, (1, fan_out), jnp.float32, -bound, bound)
        return w, b

    per_layer = []
    for _ in range(depth):
        key, k1, k2, k3, k4 = jax.random.split(key, 5)
        ln1_g = jnp.ones((1, emb_dim), jnp.float32)
        ln1_b = jnp.zeros((1, emb_dim), jnp.float32)
        wqkv, _ = linear(k1, emb_dim, 3 * emb_dim, bias=False)        # to_qkv (bias=False)
        wq = wqkv[:, :emb_dim]
        wk = wqkv[:, emb_dim:2 * emb_dim]
        wv = wqkv[:, 2 * emb_dim:]
        wo, bo = linear(k2, emb_dim, emb_dim)                         # to_out
        ln2_g = jnp.ones((1, emb_dim), jnp.float32)
        ln2_b = jnp.zeros((1, emb_dim), jnp.float32)
        w1, b1 = linear(k3, emb_dim, mlp_dim)                         # ff linear 1
        w2, b2 = linear(k4, mlp_dim, emb_dim)                         # ff linear 2
        per_layer.append((ln1_g, ln1_b, wq, wk, wv, wo, bo,
                          ln2_g, ln2_b, w1, b1, w2, b2))

    return tuple(jnp.stack([lp[i] for lp in per_layer], axis=0)
                 for i in range(len(per_layer[0])))


if __name__ == "__main__":
    # Small but lane/sublane-friendly shapes: E multiple of 128 (lane width), N multiple
    # of 16 (bf16 IO sublane packing).  batch=2, seq=16, emb=128, heads=4, mlp=256, depth=2.
    B, N, E = 2, 16, 128
    heads, mlp_dim, depth = 4, 256, 2

    key = jax.random.PRNGKey(0)
    key, kx = jax.random.split(key)
    x = jax.random.normal(kx, (B, N, E), jnp.float32)

    params = init_params(key, depth, E, mlp_dim)

    out = transformer_encoder(x, params, heads)
    out = jax.block_until_ready(out)
    assert out.shape == (B, N, E)
    # TODO(synk): mask / attn_bias / return_attn branches and PreNorm's x_kv cross-attn
    # normalization are unused by the default self-attention path and not kernelized;
    # dropout is identity (eval / p=0).
    print("KERNEL_OK")
</pallas_src>

<mosaic_0001>
module attributes {stable_mosaic.version = 11 : i64} {
  func.func @encoder_kernel(%arg0: i32, %arg1: i32, %arg2: memref<1x16x128xbf16, #tpu.memory_space<vmem>>, %arg3: memref<1x1x128xf32, #tpu.memory_space<vmem>>, %arg4: memref<1x1x128xf32, #tpu.memory_space<vmem>>, %arg5: memref<1x128x128xbf16, #tpu.memory_space<vmem>>, %arg6: memref<1x128x128xbf16, #tpu.memory_space<vmem>>, %arg7: memref<1x128x128xbf16, #tpu.memory_space<vmem>>, %arg8: memref<1x128x128xbf16, #tpu.memory_space<vmem>>, %arg9: memref<1x1x128xf32, #tpu.memory_space<vmem>>, %arg10: memref<1x1x128xf32, #tpu.memory_space<vmem>>, %arg11: memref<1x1x128xf32, #tpu.memory_space<vmem>>, %arg12: memref<1x128x256xbf16, #tpu.memory_space<vmem>>, %arg13: memref<1x1x256xf32, #tpu.memory_space<vmem>>, %arg14: memref<1x256x128xbf16, #tpu.memory_space<vmem>>, %arg15: memref<1x1x128xf32, #tpu.memory_space<vmem>>, %arg16: memref<1x16x128xbf16, #tpu.memory_space<vmem>>, %arg17: memref<16x128xf32, #tpu.memory_space<vmem>>, %arg18: memref<16x128xbf16, #tpu.memory_space<vmem>>) attributes {dimension_semantics = [#tpu.dimension_semantics<parallel>, #tpu.dimension_semantics<arbitrary>], iteration_bounds = array<i64: 2, 2>, scalar_prefetch = 0 : i64, scratch_operands = 2 : i64, tpu.core_type = #tpu.core_type<tc>, window_params = [{transform_indices = @transform_0, window_bounds = array<i64: 1, 16, 128>}, {transform_indices = @transform_1, window_bounds = array<i64: 1, 1, 128>}, {transform_indices = @transform_2, window_bounds = array<i64: 1, 1, 128>}, {transform_indices = @transform_3, window_bounds = array<i64: 1, 128, 128>}, {transform_indices = @transform_4, window_bounds = array<i64: 1, 128, 128>}, {transform_indices = @transform_5, window_bounds = array<i64: 1, 128, 128>}, {transform_indices = @transform_6, window_bounds = array<i64: 1, 128, 128>}, {transform_indices = @transform_7, window_bounds = array<i64: 1, 1, 128>}, {transform_indices = @transform_8, window_bounds = array<i64: 1, 1, 128>}, {transform_indices = @transform_9, window_bounds = array<i64: 1, 1, 128>}, {transform_indices = @transform_10, window_bounds = array<i64: 1, 128, 256>}, {transform_indices = @transform_11, window_bounds = array<i64: 1, 1, 256>}, {transform_indices = @transform_12, window_bounds = array<i64: 1, 256, 128>}, {transform_indices = @transform_13, window_bounds = array<i64: 1, 1, 128>}, {transform_indices = @transform_14, window_bounds = array<i64: 1, 16, 128>}]} {
    %c0_i32 = arith.constant 0 : i32
    %0 = arith.cmpi eq, %arg1, %c0_i32 : i32
    %1 = arith.extui %0 : i1 to i32
    %c0_i32_0 = arith.constant 0 : i32
    %2 = arith.cmpi ne, %1, %c0_i32_0 : i32
    scf.if %2 {
      %c0_100 = arith.constant 0 : index
      %c0_101 = arith.constant 0 : index
      %c0_102 = arith.constant 0 : index
      %233 = vector.load %arg2[%c0_100, %c0_101, %c0_102] : memref<1x16x128xbf16, #tpu.memory_space<vmem>>, vector<1x16x128xbf16>
      %234 = vector.shape_cast %233 : vector<1x16x128xbf16> to vector<16x128xbf16>
      %235 = arith.extf %234 : vector<16x128xbf16> to vector<16x128xf32>
      %c0_103 = arith.constant 0 : index
      %c0_104 = arith.constant 0 : index
      %236 = vector.load %arg17[%c0_103, %c0_104] : memref<16x128xf32, #tpu.memory_space<vmem>>, vector<16x128xf32>
      tpu.vector_store %arg17[%c0_103, %c0_104], %235 {strides = array<i32>} : memref<16x128xf32, #tpu.memory_space<vmem>>, vector<16x128xf32>,
    } else {
    }
    %c0 = arith.constant 0 : index
    %c0_1 = arith.constant 0 : index
    %3 = vector.load %arg17[%c0, %c0_1] : memref<16x128xf32, #tpu.memory_space<vmem>>, vector<16x128xf32>
    %c0_2 = arith.constant 0 : index
    %c0_3 = arith.constant 0 : index
    %c0_4 = arith.constant 0 : index
    %4 = vector.load %arg3[%c0_2, %c0_3, %c0_4] : memref<1x1x128xf32, #tpu.memory_space<vmem>>, vector<1x1x128xf32>
    %5 = vector.shape_cast %4 : vector<1x1x128xf32> to vector<1x128xf32>
    %c0_5 = arith.constant 0 : index
    %c0_6 = arith.constant 0 : index
    %c0_7 = arith.constant 0 : index
    %6 = vector.load %arg4[%c0_5, %c0_6, %c0_7] : memref<1x1x128xf32, #tpu.memory_space<vmem>>, vector<1x1x128xf32>
    %7 = vector.shape_cast %6 : vector<1x1x128xf32> to vector<1x128xf32>
    %cst = arith.constant dense<0.000000e+00> : vector<16xf32>
    %8 = vector.multi_reduction <add>, %3, %cst [1] : vector<16x128xf32> to vector<16xf32>
    %9 = vector.shape_cast %8 : vector<16xf32> to vector<16x1xf32>
    %cst_8 = arith.constant 1.280000e+02 : f32
    %10 = vector.broadcast %cst_8 : f32 to vector<16x1xf32>
    %11 = arith.divf %9, %10 : vector<16x1xf32>
    %12 = vector.broadcast %11 : vector<16x1xf32> to vector<16x128xf32>
    %13 = arith.subf %3, %12 : vector<16x128xf32>
    %14 = arith.mulf %13, %13 : vector<16x128xf32>
    %cst_9 = arith.constant dense<0.000000e+00> : vector<16xf32>
    %15 = vector.multi_reduction <add>, %14, %cst_9 [1] : vector<16x128xf32> to vector<16xf32>
    %16 = vector.shape_cast %15 : vector<16xf32> to vector<16x1xf32>
    %cst_10 = arith.constant 1.280000e+02 : f32
    %17 = vector.broadcast %cst_10 : f32 to vector<16x1xf32>
    %18 = arith.divf %16, %17 : vector<16x1xf32>
    %19 = vector.broadcast %11 : vector<16x1xf32> to vector<16x128xf32>
    %20 = arith.subf %3, %19 : vector<16x128xf32>
    %cst_11 = arith.constant 9.99999974E-6 : f32
    %21 = vector.broadcast %cst_11 : f32 to vector<16x1xf32>
    %22 = arith.addf %18, %21 : vector<16x1xf32>
    %23 = math.rsqrt %22 : vector<16x1xf32>
    %24 = vector.broadcast %23 : vector<16x1xf32> to vector<16x128xf32>
    %25 = arith.mulf %20, %24 : vector<16x128xf32>
    %26 = vector.broadcast %5 : vector<1x128xf32> to vector<16x128xf32>
    %27 = arith.mulf %25, %26 : vector<16x128xf32>
    %28 = vector.broadcast %7 : vector<1x128xf32> to vector<16x128xf32>
    %29 = arith.addf %27, %28 : vector<16x128xf32>
    %30 = arith.truncf %29 : vector<16x128xf32> to vector<16x128xbf16>
    %c0_12 = arith.constant 0 : index
    %c0_13 = arith.constant 0 : index
    %c0_14 = arith.constant 0 : index
    %31 = vector.load %arg5[%c0_12, %c0_13, %c0_14] : memref<1x128x128xbf16, #tpu.memory_space<vmem>>, vector<1x128x128xbf16>
    %32 = vector.shape_cast %31 : vector<1x128x128xbf16> to vector<128x128xbf16>
    %cst_15 = arith.constant dense<0.000000e+00> : vector<16x128xf32>
    %33 = tpu.matmul %30, %32, %cst_15 {dimension_numbers = #tpu.dot_dimension_numbers<[1], [0], [0], [1], [0, 0, 1, 1], [], []>} : vector<16x128xbf16>, vector<128x128xbf16>, vector<16x128xf32> -> vector<16x128xf32>
    %c0_16 = arith.constant 0 : index
    %c0_17 = arith.constant 0 : index
    %c0_18 = arith.constant 0 : index
    %34 = vector.load %arg6[%c0_16, %c0_17, %c0_18] : memref<1x128x128xbf16, #tpu.memory_space<vmem>>, vector<1x128x128xbf16>
    %35 = vector.shape_cast %34 : vector<1x128x128xbf16> to vector<128x128xbf16>
    %cst_19 = arith.constant dense<0.000000e+00> : vector<16x128xf32>
    %36 = tpu.matmul %30, %35, %cst_19 {dimension_numbers = #tpu.dot_dimension_numbers<[1], [0], [0], [1], [0, 0, 1, 1], [], []>} : vector<16x128xbf16>, vector<128x128xbf16>, vector<16x128xf32> -> vector<16x128xf32>
    %c0_20 = arith.constant 0 : index
    %c0_21 = arith.constant 0 : index
    %c0_22 = arith.constant 0 : index
    %37 = vector.load %arg7[%c0_20, %c0_21, %c0_22] : memref<1x128x128xbf16, #tpu.memory_space<vmem>>, vector<1x128x128xbf16>
    %38 = vector.shape_cast %37 : vector<1x128x128xbf16> to vector<128x128xbf16>
    %cst_23 = arith.constant dense<0.000000e+00> : vector<16x128xf32>
    %39 = tpu.matmul %30, %38, %cst_23 {dimension_numbers = #tpu.dot_dimension_numbers<[1], [0], [0], [1], [0, 0, 1, 1], [], []>} : vector<16x128xbf16>, vector<128x128xbf16>, vector<16x128xf32> -> vector<16x128xf32>
    %cst_24 = arith.constant 0.176776692 : f32
    %40 = vector.broadcast %cst_24 : f32 to vector<16x128xf32>
    %41 = arith.mulf %33, %40 : vector<16x128xf32>
    %42 = arith.truncf %41 : vector<16x128xf32> to vector<16x128xbf16>
    %43 = arith.truncf %36 : vector<16x128xf32> to vector<16x128xbf16>
    %44 = arith.truncf %39 : vector<16x128xf32> to vector<16x128xbf16>
    %45 = vector.extract_strided_slice %42 {offsets = [0, 0], sizes = [16, 32], strides = [1, 1]} : vector<16x128xbf16> to vector<16x32xbf16>
    %46 = vector.shape_cast %45 : vector<16x32xbf16> to vector<1x16x32xbf16>
    %47 = vector.extract_strided_slice %43 {offsets = [0, 0], sizes = [16, 32], strides = [1, 1]} : vector<16x128xbf16> to vector<16x32xbf16>
    %48 = vector.shape_cast %47 : vector<16x32xbf16> to vector<1x16x32xbf16>
    %49 = vector.extract_strided_slice %44 {offsets = [0, 0], sizes = [16, 32], strides = [1, 1]} : vector<16x128xbf16> to vector<16x32xbf16>
    %50 = vector.shape_cast %49 : vector<16x32xbf16> to vector<1x16x32xbf16>
    "tpu.trace_start"() <{level = 10 : i32, message = "bnd,bmd->bnm"}> : () -> ()
    %cst_25 = arith.constant dense<0.000000e+00> : vector<1x16x16xf32>
    %51 = tpu.matmul %46, %48, %cst_25 {dimension_numbers = #tpu.dot_dimension_numbers<[2], [2], [1], [1], [0, 0, 0, 1, 1, 1], [0], [0]>} : vector<1x16x32xbf16>, vector<1x16x32xbf16>, vector<1x16x16xf32> -> vector<1x16x16xf32>
    "tpu.trace_stop"() : () -> ()
    %cst_26 = arith.constant dense<0xFF800000> : vector<1x16xf32>
    %52 = vector.multi_reduction <maximumf>, %51, %cst_26 [2] : vector<1x16x16xf32> to vector<1x16xf32>
    %53 = vector.shape_cast %52 : vector<1x16xf32> to vector<1x16x1xf32>
    %54 = vector.broadcast %53 : vector<1x16x1xf32> to vector<1x16x16xf32>
    %55 = arith.subf %51, %54 : vector<1x16x16xf32>
    %56 = math.exp %55 : vector<1x16x16xf32>
    %cst_27 = arith.constant dense<0.000000e+00> : vector<1x16xf32>
    %57 = vector.multi_reduction <add>, %56, %cst_27 [2] : vector<1x16x16xf32> to vector<1x16xf32>
    %58 = vector.shape_cast %57 : vector<1x16xf32> to vector<1x16x1xf32>
    %59 = arith.truncf %56 : vector<1x16x16xf32> to vector<1x16x16xbf16>
    "tpu.trace_start"() <{level = 10 : i32, message = "bnm,bmd->bnd"}> : () -> ()
    %cst_28 = arith.constant dense<0.000000e+00> : vector<1x16x32xf32>
    %60 = tpu.matmul %59, %50, %cst_28 {dimension_numbers = #tpu.dot_dimension_numbers<[2], [1], [1], [2], [0, 0, 0, 1, 1, 2], [0], [0]>} : vector<1x16x16xbf16>, vector<1x16x32xbf16>, vector<1x16x32xf32> -> vector<1x16x32xf32>
    "tpu.trace_stop"() : () -> ()
    %61 = tpu.reciprocal %58 {approx = true} : vector<1x16x1xf32> -> vector<1x16x1xf32>
    %62 = vector.broadcast %61 : vector<1x16x1xf32> to vector<1x16x32xf32>
    %63 = arith.mulf %60, %62 : vector<1x16x32xf32>
    %64 = vector.shape_cast %63 : vector<1x16x32xf32> to vector<16x32xf32>
    %65 = arith.truncf %64 : vector<16x32xf32> to vector<16x32xbf16>
    %c0_29 = arith.constant 0 : index
    %c0_30 = arith.constant 0 : index
    %66 = vector.load %arg18[%c0_29, %c0_30] : memref<16x128xbf16, #tpu.memory_space<vmem>>, vector<16x32xbf16>
    tpu.vector_store %arg18[%c0_29, %c0_30], %65 {strides = array<i32>} : memref<16x128xbf16, #tpu.memory_space<vmem>>, vector<16x32xbf16>,
    %67 = vector.extract_strided_slice %42 {offsets = [0, 32], sizes = [16, 32], strides = [1, 1]} : vector<16x128xbf16> to vector<16x32xbf16>
    %68 = vector.shape_cast %67 : vector<16x32xbf16> to vector<1x16x32xbf16>
    %69 = vector.extract_strided_slice %43 {offsets = [0, 32], sizes = [16, 32], strides = [1, 1]} : vector<16x128xbf16> to vector<16x32xbf16>
    %70 = vector.shape_cast %69 : vector<16x32xbf16> to vector<1x16x32xbf16>
    %71 = vector.extract_strided_slice %44 {offsets = [0, 32], sizes = [16, 32], strides = [1, 1]} : vector<16x128xbf16> to vector<16x32xbf16>
    %72 = vector.shape_cast %71 : vector<16x32xbf16> to vector<1x16x32xbf16>
    "tpu.trace_start"() <{level = 10 : i32, message = "bnd,bmd->bnm"}> : () -> ()
    %cst_31 = arith.constant dense<0.000000e+00> : vector<1x16x16xf32>
    %73 = tpu.matmul %68, %70, %cst_31 {dimension_numbers = #tpu.dot_dimension_numbers<[2], [2], [1], [1], [0, 0, 0, 1, 1, 1], [0], [0]>} : vector<1x16x32xbf16>, vector<1x16x32xbf16>, vector<1x16x16xf32> -> vector<1x16x16xf32>
    "tpu.trace_stop"() : () -> ()
    %cst_32 = arith.constant dense<0xFF800000> : vector<1x16xf32>
    %74 = vector.multi_reduction <maximumf>, %73, %cst_32 [2] : vector<1x16x16xf32> to vector<1x16xf32>
    %75 = vector.shape_cast %74 : vector<1x16xf32> to vector<1x16x1xf32>
    %76 = vector.broadcast %75 : vector<1x16x1xf32> to vector<1x16x16xf32>
    %77 = arith.subf %73, %76 : vector<1x16x16xf32>
    %78 = math.exp %77 : vector<1x16x16xf32>
    %cst_33 = arith.constant dense<0.000000e+00> : vector<1x16xf32>
    %79 = vector.multi_reduction <add>, %78, %cst_33 [2] : vector<1x16x16xf32> to vector<1x16xf32>
    %80 = vector.shape_cast %79 : vector<1x16xf32> to vector<1x16x1xf32>
    %81 = arith.truncf %78 : vector<1x16x16xf32> to vector<1x16x16xbf16>
    "tpu.trace_start"() <{level = 10 : i32, message = "bnm,bmd->bnd"}> : () -> ()
    %cst_34 = arith.constant dense<0.000000e+00> : vector<1x16x32xf32>
    %82 = tpu.matmul %81, %72, %cst_34 {dimension_numbers = #tpu.dot_dimension_numbers<[2], [1], [1], [2], [0, 0, 0, 1, 1, 2], [0], [0]>} : vector<1x16x16xbf16>, vector<1x16x32xbf16>, vector<1x16x32xf32> -> vector<1x16x32xf32>
    "tpu.trace_stop"() : () -> ()
    %83 = tpu.reciprocal %80 {approx = true} : vector<1x16x1xf32> -> vector<1x16x1xf32>
    %84 = vector.broadcast %83 : vector<1x16x1xf32> to vector<1x16x32xf32>
    %85 = arith.mulf %82, %84 : vector<1x16x32xf32>
    %86 = vector.shape_cast %85 : vector<1x16x32xf32> to vector<16x32xf32>
    %87 = arith.truncf %86 : vector<16x32xf32> to vector<16x32xbf16>
    %c0_35 = arith.constant 0 : index
    %c32 = arith.constant 32 : index
    %88 = vector.load %arg18[%c0_35, %c32] : memref<16x128xbf16, #tpu.memory_space<vmem>>, vector<16x32xbf16>
    tpu.vector_store %arg18[%c0_35, %c32], %87 {strides = array<i32>} : memref<16x128xbf16, #tpu.memory_space<vmem>>, vector<16x32xbf16>,
    %89 = vector.extract_strided_slice %42 {offsets = [0, 64], sizes = [16, 32], strides = [1, 1]} : vector<16x128xbf16> to vector<16x32xbf16>
    %90 = vector.shape_cast %89 : vector<16x32xbf16> to vector<1x16x32xbf16>
    %91 = vector.extract_strided_slice %43 {offsets = [0, 64], sizes = [16, 32], strides = [1, 1]} : vector<16x128xbf16> to vector<16x32xbf16>
    %92 = vector.shape_cast %91 : vector<16x32xbf16> to vector<1x16x32xbf16>
    %93 = vector.extract_strided_slice %44 {offsets = [0, 64], sizes = [16, 32], strides = [1, 1]} : vector<16x128xbf16> to vector<16x32xbf16>
    %94 = vector.shape_cast %93 : vector<16x32xbf16> to vector<1x16x32xbf16>
    "tpu.trace_start"() <{level = 10 : i32, message = "bnd,bmd->bnm"}> : () -> ()
    %cst_36 = arith.constant dense<0.000000e+00> : vector<1x16x16xf32>
    %95 = tpu.matmul %90, %92, %cst_36 {dimension_numbers = #tpu.dot_dimension_numbers<[2], [2], [1], [1], [0, 0, 0, 1, 1, 1], [0], [0]>} : vector<1x16x32xbf16>, vector<1x16x32xbf16>, vector<1x16x16xf32> -> vector<1x16x16xf32>
    "tpu.trace_stop"() : () -> ()
    %cst_37 = arith.constant dense<0xFF800000> : vector<1x16xf32>
    %96 = vector.multi_reduction <maximumf>, %95, %cst_37 [2] : vector<1x16x16xf32> to vector<1x16xf32>
    %97 = vector.shape_cast %96 : vector<1x16xf32> to vector<1x16x1xf32>
    %98 = vector.broadcast %97 : vector<1x16x1xf32> to vector<1x16x16xf32>
    %99 = arith.subf %95, %98 : vector<1x16x16xf32>
    %100 = math.exp %99 : vector<1x16x16xf32>
    %cst_38 = arith.constant dense<0.000000e+00> : vector<1x16xf32>
    %101 = vector.multi_reduction <add>, %100, %cst_38 [2] : vector<1x16x16xf32> to vector<1x16xf32>
    %102 = vector.shape_cast %101 : vector<1x16xf32> to vector<1x16x1xf32>
    %103 = arith.truncf %100 : vector<1x16x16xf32> to vector<1x16x16xbf16>
    "tpu.trace_start"() <{level = 10 : i32, message = "bnm,bmd->bnd"}> : () -> ()
    %cst_39 = arith.constant dense<0.000000e+00> : vector<1x16x32xf32>
    %104 = tpu.matmul %103, %94, %cst_39 {dimension_numbers = #tpu.dot_dimension_numbers<[2], [1], [1], [2], [0, 0, 0, 1, 1, 2], [0], [0]>} : vector<1x16x16xbf16>, vector<1x16x32xbf16>, vector<1x16x32xf32> -> vector<1x16x32xf32>
    "tpu.trace_stop"() : () -> ()
    %105 = tpu.reciprocal %102 {approx = true} : vector<1x16x1xf32> -> vector<1x16x1xf32>
    %106 = vector.broadcast %105 : vector<1x16x1xf32> to vector<1x16x32xf32>
    %107 = arith.mulf %104, %106 : vector<1x16x32xf32>
    %108 = vector.shape_cast %107 : vector<1x16x32xf32> to vector<16x32xf32>
    %109 = arith.truncf %108 : vector<16x32xf32> to vector<16x32xbf16>
    %c0_40 = arith.constant 0 : index
    %c64 = arith.constant 64 : index
    %110 = vector.load %arg18[%c0_40, %c64] : memref<16x128xbf16, #tpu.memory_space<vmem>>, vector<16x32xbf16>
    tpu.vector_store %arg18[%c0_40, %c64], %109 {strides = array<i32>} : memref<16x128xbf16, #tpu.memory_space<vmem>>, vector<16x32xbf16>,
    %111 = vector.extract_strided_slice %42 {offsets = [0, 96], sizes = [16, 32], strides = [1, 1]} : vector<16x128xbf16> to vector<16x32xbf16>
    %112 = vector.shape_cast %111 : vector<16x32xbf16> to vector<1x16x32xbf16>
    %113 = vector.extract_strided_slice %43 {offsets = [0, 96], sizes = [16, 32], strides = [1, 1]} : vector<16x128xbf16> to vector<16x32xbf16>
    %114 = vector.shape_cast %113 : vector<16x32xbf16> to vector<1x16x32xbf16>
    %115 = vector.extract_strided_slice %44 {offsets = [0, 96], sizes = [16, 32], strides = [1, 1]} : vector<16x128xbf16> to vector<16x32xbf16>
    %116 = vector.shape_cast %115 : vector<16x32xbf16> to vector<1x16x32xbf16>
    "tpu.trace_start"() <{level = 10 : i32, message = "bnd,bmd->bnm"}> : () -> ()
    %cst_41 = arith.constant dense<0.000000e+00> : vector<1x16x16xf32>
    %117 = tpu.matmul %112, %114, %cst_41 {dimension_numbers = #tpu.dot_dimension_numbers<[2], [2], [1], [1], [0, 0, 0, 1, 1, 1], [0], [0]>} : vector<1x16x32xbf16>, vector<1x16x32xbf16>, vector<1x16x16xf32> -> vector<1x16x16xf32>
    "tpu.trace_stop"() : () -> ()
    %cst_42 = arith.constant dense<0xFF800000> : vector<1x16xf32>
    %118 = vector.multi_reduction <maximumf>, %117, %cst_42 [2] : vector<1x16x16xf32> to vector<1x16xf32>
    %119 = vector.shape_cast %118 : vector<1x16xf32> to vector<1x16x1xf32>
    %120 = vector.broadcast %119 : vector<1x16x1xf32> to vector<1x16x16xf32>
    %121 = arith.subf %117, %120 : vector<1x16x16xf32>
    %122 = math.exp %121 : vector<1x16x16xf32>
    %cst_43 = arith.constant dense<0.000000e+00> : vector<1x16xf32>
    %123 = vector.multi_reduction <add>, %122, %cst_43 [2] : vector<1x16x16xf32> to vector<1x16xf32>
    %124 = vector.shape_cast %123 : vector<1x16xf32> to vector<1x16x1xf32>
    %125 = arith.truncf %122 : vector<1x16x16xf32> to vector<1x16x16xbf16>
    "tpu.trace_start"() <{level = 10 : i32, message = "bnm,bmd->bnd"}> : () -> ()
    %cst_44 = arith.constant dense<0.000000e+00> : vector<1x16x32xf32>
    %126 = tpu.matmul %125, %116, %cst_44 {dimension_numbers = #tpu.dot_dimension_numbers<[2], [1], [1], [2], [0, 0, 0, 1, 1, 2], [0], [0]>} : vector<1x16x16xbf16>, vector<1x16x32xbf16>, vector<1x16x32xf32> -> vector<1x16x32xf32>
    "tpu.trace_stop"() : () -> ()
    %127 = tpu.reciprocal %124 {approx = true} : vector<1x16x1xf32> -> vector<1x16x1xf32>
    %128 = vector.broadcast %127 : vector<1x16x1xf32> to vector<1x16x32xf32>
    %129 = arith.mulf %126, %128 : vector<1x16x32xf32>
    %130 = vector.shape_cast %129 : vector<1x16x32xf32> to vector<16x32xf32>
    %131 = arith.truncf %130 : vector<16x32xf32> to vector<16x32xbf16>
    %c0_45 = arith.constant 0 : index
    %c96 = arith.constant 96 : index
    %132 = vector.load %arg18[%c0_45, %c96] : memref<16x128xbf16, #tpu.memory_space<vmem>>, vector<16x32xbf16>
    tpu.vector_store %arg18[%c0_45, %c96], %131 {strides = array<i32>} : memref<16x128xbf16, #tpu.memory_space<vmem>>, vector<16x32xbf16>,
    %c0_46 = arith.constant 0 : index
    %c0_47 = arith.constant 0 : index
    %133 = vector.load %arg18[%c0_46, %c0_47] : memref<16x128xbf16, #tpu.memory_space<vmem>>, vector<16x128xbf16>
    %c0_48 = arith.constant 0 : index
    %c0_49 = arith.constant 0 : index
    %c0_50 = arith.constant 0 : index
    %134 = vector.load %arg8[%c0_48, %c0_49, %c0_50] : memref<1x128x128xbf16, #tpu.memory_space<vmem>>, vector<1x128x128xbf16>
    %135 = vector.shape_cast %134 : vector<1x128x128xbf16> to vector<128x128xbf16>
    %cst_51 = arith.constant dense<0.000000e+00> : vector<16x128xf32>
    %136 = tpu.matmul %133, %135, %cst_51 {dimension_numbers = #tpu.dot_dimension_numbers<[1], [0], [0], [1], [0, 0, 1, 1], [], []>} : vector<16x128xbf16>, vector<128x128xbf16>, vector<16x128xf32> -> vector<16x128xf32>
    %c0_52 = arith.constant 0 : index
    %c0_53 = arith.constant 0 : index
    %c0_54 = arith.constant 0 : index
    %137 = vector.load %arg9[%c0_52, %c0_53, %c0_54] : memref<1x1x128xf32, #tpu.memory_space<vmem>>, vector<1x1x128xf32>
    %138 = vector.shape_cast %137 : vector<1x1x128xf32> to vector<1x128xf32>
    %139 = vector.broadcast %138 : vector<1x128xf32> to vector<16x128xf32>
    %140 = arith.addf %136, %139 : vector<16x128xf32>
    %141 = arith.addf %3, %140 : vector<16x128xf32>
    %c0_55 = arith.constant 0 : index
    %c0_56 = arith.constant 0 : index
    %c0_57 = arith.constant 0 : index
    %142 = vector.load %arg10[%c0_55, %c0_56, %c0_57] : memref<1x1x128xf32, #tpu.memory_space<vmem>>, vector<1x1x128xf32>
    %143 = vector.shape_cast %142 : vector<1x1x128xf32> to vector<1x128xf32>
    %c0_58 = arith.constant 0 : index
    %c0_59 = arith.constant 0 : index
    %c0_60 = arith.constant 0 : index
    %144 = vector.load %arg11[%c0_58, %c0_59, %c0_60] : memref<1x1x128xf32, #tpu.memory_space<vmem>>, vector<1x1x128xf32>
    %145 = vector.shape_cast %144 : vector<1x1x128xf32> to vector<1x128xf32>
    %cst_61 = arith.constant dense<0.000000e+00> : vector<16xf32>
    %146 = vector.multi_reduction <add>, %141, %cst_61 [1] : vector<16x128xf32> to vector<16xf32>
    %147 = vector.shape_cast %146 : vector<16xf32> to vector<16x1xf32>
    %cst_62 = arith.constant 1.280000e+02 : f32
    %148 = vector.broadcast %cst_62 : f32 to vector<16x1xf32>
    %149 = arith.divf %147, %148 : vector<16x1xf32>
    %150 = vector.broadcast %149 : vector<16x1xf32> to vector<16x128xf32>
    %151 = arith.subf %141, %150 : vector<16x128xf32>
    %152 = arith.mulf %151, %151 : vector<16x128xf32>
    %cst_63 = arith.constant dense<0.000000e+00> : vector<16xf32>
    %153 = vector.multi_reduction <add>, %152, %cst_63 [1] : vector<16x128xf32> to vector<16xf32>
    %154 = vector.shape_cast %153 : vector<16xf32> to vector<16x1xf32>
    %cst_64 = arith.constant 1.280000e+02 : f32
    %155 = vector.broadcast %cst_64 : f32 to vector<16x1xf32>
    %156 = arith.divf %154, %155 : vector<16x1xf32>
    %157 = vector.broadcast %149 : vector<16x1xf32> to vector<16x128xf32>
    %158 = arith.subf %141, %157 : vector<16x128xf32>
    %cst_65 = arith.constant 9.99999974E-6 : f32
    %159 = vector.broadcast %cst_65 : f32 to vector<16x1xf32>
    %160 = arith.addf %156, %159 : vector<16x1xf32>
    %161 = math.rsqrt %160 : vector<16x1xf32>
    %162 = vector.broadcast %161 : vector<16x1xf32> to vector<16x128xf32>
    %163 = arith.mulf %158, %162 : vector<16x128xf32>
    %164 = vector.broadcast %143 : vector<1x128xf32> to vector<16x128xf32>
    %165 = arith.mulf %163, %164 : vector<16x128xf32>
    %166 = vector.broadcast %145 : vector<1x128xf32> to vector<16x128xf32>
    %167 = arith.addf %165, %166 : vector<16x128xf32>
    %168 = arith.truncf %167 : vector<16x128xf32> to vector<16x128xbf16>
    %c0_66 = arith.constant 0 : index
    %c0_67 = arith.constant 0 : index
    %c0_68 = arith.constant 0 : index
    %169 = vector.load %arg12[%c0_66, %c0_67, %c0_68] : memref<1x128x256xbf16, #tpu.memory_space<vmem>>, vector<1x128x256xbf16>
    %170 = vector.shape_cast %169 : vector<1x128x256xbf16> to vector<128x256xbf16>
    %cst_69 = arith.constant dense<0.000000e+00> : vector<16x256xf32>
    %171 = tpu.matmul %168, %170, %cst_69 {dimension_numbers = #tpu.dot_dimension_numbers<[1], [0], [0], [1], [0, 0, 1, 1], [], []>} : vector<16x128xbf16>, vector<128x256xbf16>, vector<16x256xf32> -> vector<16x256xf32>
    %c0_70 = arith.constant 0 : index
    %c0_71 = arith.constant 0 : index
    %c0_72 = arith.constant 0 : index
    %172 = vector.load %arg13[%c0_70, %c0_71, %c0_72] : memref<1x1x256xf32, #tpu.memory_space<vmem>>, vector<1x1x256xf32>
    %173 = vector.shape_cast %172 : vector<1x1x256xf32> to vector<1x256xf32>
    %174 = vector.broadcast %173 : vector<1x256xf32> to vector<16x256xf32>
    %175 = arith.addf %171, %174 : vector<16x256xf32>
    %cst_73 = arith.constant 5.000000e-01 : f32
    %176 = vector.broadcast %cst_73 : f32 to vector<16x256xf32>
    %177 = arith.mulf %176, %175 : vector<16x256xf32>
    %cst_74 = arith.constant 0.707106769 : f32
    %178 = vector.broadcast %cst_74 : f32 to vector<16x256xf32>
    %179 = arith.mulf %175, %178 : vector<16x256xf32>
    %cst_75 = arith.constant 0.000000e+00 : f32
    %180 = vector.broadcast %cst_75 : f32 to vector<16x256xf32>
    %181 = arith.cmpf oge, %179, %180 : vector<16x256xf32>
    %cst_76 = arith.constant 0.000000e+00 : f32
    %182 = vector.broadcast %cst_76 : f32 to vector<16x256xf32>
    %183 = arith.subf %182, %179 : vector<16x256xf32>
    %184 = arith.select %181, %179, %183 : vector<16x256xi1>, vector<16x256xf32>
    %cst_77 = arith.constant 0.327591091 : f32
    %185 = vector.broadcast %cst_77 : f32 to vector<16x256xf32>
    %186 = arith.mulf %185, %184 : vector<16x256xf32>
    %cst_78 = arith.constant 1.000000e+00 : f32
    %187 = vector.broadcast %cst_78 : f32 to vector<16x256xf32>
    %188 = arith.addf %187, %186 : vector<16x256xf32>
    %cst_79 = arith.constant 1.000000e+00 : f32
    %189 = vector.broadcast %cst_79 : f32 to vector<16x256xf32>
    %190 = arith.divf %189, %188 : vector<16x256xf32>
    %cst_80 = arith.constant 1.06140542 : f32
    %191 = vector.broadcast %cst_80 : f32 to vector<16x256xf32>
    %192 = arith.mulf %190, %191 : vector<16x256xf32>
    %cst_81 = arith.constant -1.45315206 : f32
    %193 = vector.broadcast %cst_81 : f32 to vector<16x256xf32>
    %194 = arith.addf %193, %192 : vector<16x256xf32>
    %195 = arith.mulf %190, %194 : vector<16x256xf32>
    %cst_82 = arith.constant 1.42141378 : f32
    %196 = vector.broadcast %cst_82 : f32 to vector<16x256xf32>
    %197 = arith.addf %196, %195 : vector<16x256xf32>
    %198 = arith.mulf %190, %197 : vector<16x256xf32>
    %cst_83 = arith.constant -0.284496725 : f32
    %199 = vector.broadcast %cst_83 : f32 to vector<16x256xf32>
    %200 = arith.addf %199, %198 : vector<16x256xf32>
    %201 = arith.mulf %190, %200 : vector<16x256xf32>
    %cst_84 = arith.constant 0.254829586 : f32
    %202 = vector.broadcast %cst_84 : f32 to vector<16x256xf32>
    %203 = arith.addf %202, %201 : vector<16x256xf32>
    %204 = arith.mulf %190, %203 : vector<16x256xf32>
    %205 = arith.mulf %184, %184 : vector<16x256xf32>
    %cst_85 = arith.constant 0.000000e+00 : f32
    %206 = vector.broadcast %cst_85 : f32 to vector<16x256xf32>
    %207 = arith.subf %206, %205 : vector<16x256xf32>
    %208 = math.exp %207 : vector<16x256xf32>
    %209 = arith.mulf %204, %208 : vector<16x256xf32>
    %cst_86 = arith.constant 1.000000e+00 : f32
    %210 = vector.broadcast %cst_86 : f32 to vector<16x256xf32>
    %211 = arith.subf %210, %209 : vector<16x256xf32>
    %cst_87 = arith.constant 0.000000e+00 : f32
    %212 = vector.broadcast %cst_87 : f32 to vector<16x256xf32>
    %213 = arith.cmpf oge, %179, %212 : vector<16x256xf32>
    %cst_88 = arith.constant 0.000000e+00 : f32
    %214 = vector.broadcast %cst_88 : f32 to vector<16x256xf32>
    %215 = arith.subf %214, %211 : vector<16x256xf32>
    %216 = arith.select %213, %211, %215 : vector<16x256xi1>, vector<16x256xf32>
    %cst_89 = arith.constant 1.000000e+00 : f32
    %217 = vector.broadcast %cst_89 : f32 to vector<16x256xf32>
    %218 = arith.addf %217, %216 : vector<16x256xf32>
    %219 = arith.mulf %177, %218 : vector<16x256xf32>
    %220 = arith.truncf %219 : vector<16x256xf32> to vector<16x256xbf16>
    %c0_90 = arith.constant 0 : index
    %c0_91 = arith.constant 0 : index
    %c0_92 = arith.constant 0 : index
    %221 = vector.load %arg14[%c0_90, %c0_91, %c0_92] : memref<1x256x128xbf16, #tpu.memory_space<vmem>>, vector<1x256x128xbf16>
    %222 = vector.shape_cast %221 : vector<1x256x128xbf16> to vector<256x128xbf16>
    %cst_93 = arith.constant dense<0.000000e+00> : vector<16x128xf32>
    %223 = tpu.matmul %220, %222, %cst_93 {dimension_numbers = #tpu.dot_dimension_numbers<[1], [0], [0], [1], [0, 0, 1, 1], [], []>} : vector<16x256xbf16>, vector<256x128xbf16>, vector<16x128xf32> -> vector<16x128xf32>
    %c0_94 = arith.constant 0 : index
    %c0_95 = arith.constant 0 : index
    %c0_96 = arith.constant 0 : index
    %224 = vector.load %arg15[%c0_94, %c0_95, %c0_96] : memref<1x1x128xf32, #tpu.memory_space<vmem>>, vector<1x1x128xf32>
    %225 = vector.shape_cast %224 : vector<1x1x128xf32> to vector<1x128xf32>
    %226 = vector.broadcast %225 : vector<1x128xf32> to vector<16x128xf32>
    %227 = arith.addf %223, %226 : vector<16x128xf32>
    %228 = arith.addf %141, %227 : vector<16x128xf32>
    %c0_97 = arith.constant 0 : index
    %c0_98 = arith.constant 0 : index
    %229 = vector.load %arg17[%c0_97, %c0_98] : memref<16x128xf32, #tpu.memory_space<vmem>>, vector<16x128xf32>
    tpu.vector_store %arg17[%c0_97, %c0_98], %228 {strides = array<i32>} : memref<16x128xf32, #tpu.memory_space<vmem>>, vector<16x128xf32>,
    %c1_i32 = arith.constant 1 : i32
    %230 = arith.cmpi eq, %arg1, %c1_i32 : i32
    %231 = arith.extui %230 : i1 to i32
    %c0_i32_99 = arith.constant 0 : i32
    %232 = arith.cmpi ne, %231, %c0_i32_99 : i32
    scf.if %232 {
      %233 = vector.shape_cast %228 : vector<16x128xf32> to vector<1x16x128xf32>
      %234 = arith.truncf %233 : vector<1x16x128xf32> to vector<1x16x128xbf16>
      %c0_100 = arith.constant 0 : index
      %c0_101 = arith.constant 0 : index
      %c0_102 = arith.constant 0 : index
      %235 = vector.load %arg16[%c0_100, %c0_101, %c0_102] : memref<1x16x128xbf16, #tpu.memory_space<vmem>>, vector<1x16x128xbf16>
      tpu.vector_store %arg16[%c0_100, %c0_101, %c0_102], %234 {strides = array<i32>} : memref<1x16x128xbf16, #tpu.memory_space<vmem>>, vector<1x16x128xbf16>,
    } else {
    }
    return
  }
  func.func @transform_0(%arg0: i32, %arg1: i32) -> (i32, i32, i32) {
    %c0_i32 = arith.constant 0 : i32
    %c0_i32_0 = arith.constant 0 : i32
    %c0_i32_1 = arith.constant 0 : i32
    return %arg0, %c0_i32, %c0_i32_0 : i32, i32, i32
  }
  func.func @transform_1(%arg0: i32, %arg1: i32) -> (i32, i32, i32) {
    %c0_i32 = arith.constant 0 : i32
    %c0_i32_0 = arith.constant 0 : i32
    %c0_i32_1 = arith.constant 0 : i32
    return %arg1, %c0_i32, %c0_i32_0 : i32, i32, i32
  }
  func.func @transform_2(%arg0: i32, %arg1: i32) -> (i32, i32, i32) {
    %c0_i32 = arith.constant 0 : i32
    %c0_i32_0 = arith.constant 0 : i32
    %c0_i32_1 = arith.constant 0 : i32
    return %arg1, %c0_i32, %c0_i32_0 : i32, i32, i32
  }
  func.func @transform_3(%arg0: i32, %arg1: i32) -> (i32, i32, i32) {
    %c0_i32 = arith.constant 0 : i32
    %c0_i32_0 = arith.constant 0 : i32
    %c0_i32_1 = arith.constant 0 : i32
    return %arg1, %c0_i32, %c0_i32_0 : i32, i32, i32
  }
  func.func @transform_4(%arg0: i32, %arg1: i32) -> (i32, i32, i32) {
    %c0_i32 = arith.constant 0 : i32
    %c0_i32_0 = arith.constant 0 : i32
    %c0_i32_1 = arith.constant 0 : i32
    return %arg1, %c0_i32, %c0_i32_0 : i32, i32, i32
  }
  func.func @transform_5(%arg0: i32, %arg1: i32) -> (i32, i32, i32) {
    %c0_i32 = arith.constant 0 : i32
    %c0_i32_0 = arith.constant 0 : i32
    %c0_i32_1 = arith.constant 0 : i32
    return %arg1, %c0_i32, %c0_i32_0 : i32, i32, i32
  }
  func.func @transform_6(%arg0: i32, %arg1: i32) -> (i32, i32, i32) {
    %c0_i32 = arith.constant 0 : i32
    %c0_i32_0 = arith.constant 0 : i32
    %c0_i32_1 = arith.constant 0 : i32
    return %arg1, %c0_i32, %c0_i32_0 : i32, i32, i32
  }
  func.func @transform_7(%arg0: i32, %arg1: i32) -> (i32, i32, i32) {
    %c0_i32 = arith.constant 0 : i32
    %c0_i32_0 = arith.constant 0 : i32
    %c0_i32_1 = arith.constant 0 : i32
    return %arg1, %c0_i32, %c0_i32_0 : i32, i32, i32
  }
  func.func @transform_8(%arg0: i32, %arg1: i32) -> (i32, i32, i32) {
    %c0_i32 = arith.constant 0 : i32
    %c0_i32_0 = arith.constant 0 : i32
    %c0_i32_1 = arith.constant 0 : i32
    return %arg1, %c0_i32, %c0_i32_0 : i32, i32, i32
  }
  func.func @transform_9(%arg0: i32, %arg1: i32) -> (i32, i32, i32) {
    %c0_i32 = arith.constant 0 : i32
    %c0_i32_0 = arith.constant 0 : i32
    %c0_i32_1 = arith.constant 0 : i32
    return %arg1, %c0_i32, %c0_i32_0 : i32, i32, i32
  }
  func.func @transform_10(%arg0: i32, %arg1: i32) -> (i32, i32, i32) {
    %c0_i32 = arith.constant 0 : i32
    %c0_i32_0 = arith.constant 0 : i32
    %c0_i32_1 = arith.constant 0 : i32
    return %arg1, %c0_i32, %c0_i32_0 : i32, i32, i32
  }
  func.func @transform_11(%arg0: i32, %arg1: i32) -> (i32, i32, i32) {
    %c0_i32 = arith.constant 0 : i32
    %c0_i32_0 = arith.constant 0 : i32
    %c0_i32_1 = arith.constant 0 : i32
    return %arg1, %c0_i32, %c0_i32_0 : i32, i32, i32
  }
  func.func @transform_12(%arg0: i32, %arg1: i32) -> (i32, i32, i32) {
    %c0_i32 = arith.constant 0 : i32
    %c0_i32_0 = arith.constant 0 : i32
    %c0_i32_1 = arith.constant 0 : i32
    return %arg1, %c0_i32, %c0_i32_0 : i32, i32, i32
  }
  func.func @transform_13(%arg0: i32, %arg1: i32) -> (i32, i32, i32) {
    %c0_i32 = arith.constant 0 : i32
    %c0_i32_0 = arith.constant 0 : i32
    %c0_i32_1 = arith.constant 0 : i32
    return %arg1, %c0_i32, %c0_i32_0 : i32, i32, i32
  }
  func.func @transform_14(%arg0: i32, %arg1: i32) -> (i32, i32, i32) {
    %c0_i32 = arith.constant 0 : i32
    %c0_i32_0 = arith.constant 0 : i32
    %c0_i32_1 = arith.constant 0 : i32
    return %arg0, %c0_i32, %c0_i32_0 : i32, i32, i32
  }
}

</mosaic_0001>

<bundles_post_ra>
// kernel: tpu_custom_call.1
= control target key start
LH: loop header
LB: loop body
LE: loop exit
PB: predicated region body
PF: predicated region fallthrough
CT: control target
= control target key end

     0   :  { %s4368_s0 = inlined_call_operand.hbm [shape: bf16[2,16,128], index: 0, kind: input, shape index: {}]   ;;  %s4369_s1 = inlined_call_operand.hbm [shape: f32[2,1,128], index: 1, kind: input, shape index: {}]   ;;  %s4370_s2 = inlined_call_operand.hbm [shape: f32[2,1,128], index: 2, kind: input, shape index: {}]   ;;  %s4371_s3 = inlined_call_operand.hbm [shape: bf16[2,128,128], index: 3, kind: input, shape index: {}]   ;;  %s4372_s4 = inlined_call_operand.hbm [shape: bf16[2,128,128], index: 4, kind: input, shape index: {}]   ;;  %s4373_s5 = inlined_call_operand.hbm [shape: bf16[2,128,128], index: 5, kind: input, shape index: {}]   ;;  %s4374_s6 = inlined_call_operand.hbm [shape: bf16[2,128,128], index: 6, kind: input, shape index: {}]   ;;  %s4375_s7 = inlined_call_operand.vmem [shape: f32[2,1,128], index: 7, kind: input, shape index: {}]   ;;  %s4376_s8 = inlined_call_operand.hbm [shape: f32[2,1,128], index: 8, kind: input, shape index: {}]   ;;  %s4377_s9 = inlined_call_operand.vmem [shape: f32[2,1,128], index: 9, kind: input, shape index: {}]   ;;  %s4378_s10 = inlined_call_operand.hbm [shape: bf16[2,128,256], index: 10, kind: input, shape index: {}]   ;;  %s4379_s11 = inlined_call_operand.vmem [shape: f32[2,1,256], index: 11, kind: input, shape index: {}]   ;;  %s4380_s12 = inlined_call_operand.hbm [shape: bf16[2,256,128], index: 12, kind: input, shape index: {}]   ;;  %s4381_s13 = inlined_call_operand.vmem [shape: f32[2,1,128], index: 13, kind: input, shape index: {}]   ;;  %s4382_s14 = inlined_call_operand.hbm [shape: bf16[2,16,128], index: 14, kind: output, shape index: {}]  }
   0x1   :  { %4407 = sst [smem:[#allocation45_spill]] %s4368_s0 }
   0x2   :  { %4408 = sst [smem:[#allocation46_spill]] %s4369_s1 }
   0x3   :  { %4409 = sst [smem:[#allocation47_spill]] %s4370_s2 }
   0x4   :  { %4410 = sst [smem:[#allocation48_spill]] %s4371_s3 }
   0x5   :  { %4411 = sst [smem:[#allocation49_spill]] %s4372_s4 }
   0x6   :  { %4412 = sst [smem:[#allocation50_spill]] %s4373_s5 }
   0x7   :  { %4413 = sst [smem:[#allocation51_spill]] %s4374_s6 }
   0x8   :  { %4414 = sst [smem:[#allocation52_spill]] %s4375_s7 }
   0x9   :  { %4415 = sst [smem:[#allocation53_spill]] %s4376_s8 }
   0xa   :  { %4416 = sst [smem:[#allocation54_spill]] %s4377_s9 }
   0xb   :  { %4417 = sst [smem:[#allocation55_spill]] %s4378_s10 }
   0xc   :  { %4418 = sst [smem:[#allocation56_spill]] %s4379_s11 }
   0xd   :  { %4419 = sst [smem:[#allocation57_spill]] %s4380_s12 }
   0xe   :  { %4420 = sst [smem:[#allocation58_spill]] %s4381_s13 }
   0xf   :  { %4421 = sst [smem:[#allocation59_spill]] %s4382_s14 }
  0x10   :  { %19 = vsyncpa [#allocation5], 0 }
  0x11   :  { %21 = vsyncpa [#allocation5 + $0x1], 0 }
  0x12   :  { %22 = vsyncpa [#allocation8], 0 }
  0x13   :  { %24 = vsyncpa [#allocation8 + $0x1], 0 }
  0x14   :  { %25 = vsyncpa [#allocation11], 0 }
  0x15   :  { %27 = vsyncpa [#allocation11 + $0x1], 0 }
  0x16   :  { %28 = vsyncpa [#allocation14], 0 }
  0x17   :  { %30 = vsyncpa [#allocation14 + $0x1], 0 }
  0x18   :  { %31 = vsyncpa [#allocation17], 0 }
  0x19   :  { %33 = vsyncpa [#allocation17 + $0x1], 0 }
  0x1a   :  { %34 = vsyncpa [#allocation20], 0 }
  0x1b   :  { %36 = vsyncpa [#allocation20 + $0x1], 0 }
  0x1c   :  { %37 = vsyncpa [#allocation6], 0 }
  0x1d   :  { %39 = vsyncpa [#allocation6 + $0x1], 0  ;;  %s3641_s29 = smov 0   ;;  %s3643_s30 = smov 0  }
  0x1e   :  { %s3645_s15 = smov 0   ;;  %s3647_s16 = smov 0  }
  0x1f   :  { %s3649_s17 = smov 0   ;;  %s3651_s18 = smov 0  }
  0x20   :  { %s3653_s19 = smov 0   ;;  %s3655_s20 = smov 0  }
  0x21   :  { %s3657_s21 = smov 0   ;;  %s3659_s22 = smov 0  }
  0x22   :  { %s3661_s23 = smov 0  }
  0x23 LB: > { %4422 = sst [smem:[#allocation29_spill]] %s3519_s30  ;;  %s54_s24 = sadd.s32 1, %s3547_s21  ;;  %s3555_s23 = sphi %s3661_s23, %s45_s23   ;;  %s3551_s22 = sphi %s3659_s22, %s4492_s22   ;;  %s3547_s21 = sphi %s3657_s21, %s4491_s21   ;;  %s3543_s20 = sphi %s3655_s20, %s4490_s20   ;;  %s3539_s19 = sphi %s3653_s19, %s4489_s19   ;;  %s3535_s18 = sphi %s3651_s18, %s4488_s18   ;;  %s3531_s17 = sphi %s3649_s17, %s4487_s17   ;;  %s3527_s16 = sphi %s3647_s16, %s4486_s16   ;;  %s3523_s15 = sphi %s3645_s15, %s4485_s15   ;;  %s3519_s30 = sphi %s3643_s30, %s4484_s30   ;;  %s3515_s29 = sphi %s3641_s29, %s4483_s29  }
  0x24   : > { %4423 = sst [smem:[#allocation30_spill]] %s3523_s15  ;;  %p72_p0 = scmp.eq.s32.totalorder %s3555_s23, 0 }
  0x25   : > { %4424 = sst [smem:[#allocation31_spill]] %s3527_s16  ;;  %p3698_p1 = scmp.ge.s32.totalorder %s54_s24, 2 }
  0x26   : > { %4425 = sst [smem:[#allocation32_spill]] %s3531_s17  ;;  %s90_s26 = sadd.s32 1, %s3523_s15 }
  0x27   : > { %4426 = sst [smem:[#allocation33_spill]] %s3535_s18  ;;  %p97_p2 = scmp.ne.s32.totalorder %s3523_s15, %s3519_s30 }
  0x28   : > { %4427 = sst [smem:[#allocation34_spill]] %s3539_s19  ;;  %p103_p3 = scmp.ne.s32.totalorder %s3519_s30, %s3515_s29 }
  0x29   : > { %4428 = sst [smem:[#allocation35_spill]] %s3543_s20  ;;  %s4494_s24 = smov (%p3698_p1, %s54_s24), 0 }
  0x2a   : > { %4429 = sst [smem:[#allocation36_spill]] %s3547_s21  ;;  %p3713_p4 = por %p97_p2, %p72_p0 }
  0x2b   : > { %4430 = sst [smem:[#allocation37_spill]] %s3551_s22  ;;  %s87_s28 = ssub.s32 %s3547_s21, %s4494_s24 }
  0x2c   : > { %4432 = sst [smem:[#allocation38_spill]] %s4494_s24  ;;  %p2950_p5 = scmp.lt.s32.totalorder %s3555_s23, 4 }
  0x2d   : > { %p88_p6 = scmp.eq.s32.totalorder %s87_s28, 0  ;;  %s3721_s14 = sand.u32 1, %s3555_s23  }
  0x2e   : > { %s3724_s20 = sand.u32 1, %s3523_s15   ;;  %s4435_s1 = sld [smem:[#allocation46_spill]] }
  0x2f   : > { %s3727_s11 = scalar_select %p88_p6, %s3523_s15, %s90_s26  }
  0x30   : > { %s490_s12 = scalar_lea.vmem [#allocation7], %s3724_s20  ;;  %p3738_p7 = pnand %p2950_p5, %p3713_p4 }
  0x31   : > { %4434 = sst [smem:[#allocation39_spill]] %s3727_s11  ;;  %s497_s24 = sshll.u32 %s490_s12, 4  ;;  %s498_s24 = int_to_ptr.vmem [resolvable:$true] %s497_s24 }
  0x32   : > { %p2526_p8 = scmp.ge.s32.totalorder %s3555_s23, 1  ;;  %p693_p9 = scmp.lt.s32.totalorder %s3555_s23, 5 }
  0x33   : > { %s4386_s26 = scalar_lea.sflag [#allocation8], %s3721_s14  ;;  %s3754_s9 = sshll.u32 %s3724_s20, 6 }
  0x34   : > { %s493_s7 = scalar_lea.hbm %s4435_s1, %s3547_s21  ;;  %p3749_p10 = pnand %p2526_p8, %p693_p9 }
  0x35   : > { %s495_s19 = sshll.u32 %s493_s7, 4  ;;  %s3757_s12 = sshll.u32 %s3547_s21, 6  ;;  %s496_s19 = int_to_ptr.hbm [resolvable:$true] %s495_s19 }
  0x36   : > { %2921 = dma.hbm_to_vmem [thread:$0]  (!%p3738_p7), %s496_s19, 16, %s498_s24, %s4386_s26  }
  0x37   : > { %s4437_s7 = scalar_select %p3749_p10, 1, 0 }
  0x38   : > { %s4439_s3 = sld [smem:[#allocation48_spill]]  ;;  %s525_s19 = scalar_lea.vmem [#allocation10], %s3754_s9 }
  0x39   : > { %4438 = sst [smem:[#allocation40_spill]] %s4437_s7  ;;  %s533_s24 = sshll.u32 %s525_s19, 4  ;;  %s534_s24 = int_to_ptr.vmem [resolvable:$true] %s533_s24 }
  0x3a   : > { %s4389_s26 = scalar_lea.sflag [#allocation11], %s3721_s14  ;;  %s4392_s15 = smov 64  }
  0x3b   : > { %s4394_s7 = smov 4   ;;  %s4440_s5 = sld [smem:[#allocation50_spill]] }
  0x3c   : > { %s569_s19 = scalar_lea.vmem [#allocation13], %s3754_s9  ;;  %s4441_s8 = sld [smem:[#allocation53_spill]] }
  0x3d   : > { %s64_s13 = sadd.s32 1, %s3535_s18  ;;  %p71_p11 = scmp.ne.s32.totalorder %s3535_s18, %s3531_s17 }
  0x3e   : > { %s530_s1 = scalar_lea.hbm %s4439_s3, %s3757_s12  ;;  %s577_s3 = sshll.u32 %s569_s19, 4  ;;  %s578_s3 = int_to_ptr.vmem [resolvable:$true] %s577_s3 }
  0x3f   : > { %s531_s11 = sshll.u32 %s530_s1, 4  ;;  %s618_s19 = scalar_lea.vmem [#allocation16], %s3724_s20  ;;  %s532_s11 = int_to_ptr.hbm [resolvable:$true] %s531_s11 }
  0x40   : > { %2927 = dma.hbm_to_vmem [thread:$0]  (!%p3738_p7), %s532_s11, 1024, %s534_s24, %s4389_s26, %s4392_s15, %s4392_s15, %s4394_s7  }
  0x41   : > { %s574_s27 = scalar_lea.hbm %s4440_s5, %s3757_s12  ;;  %s4391_s11 = scalar_lea.sflag [#allocation14], %s3721_s14 }
  0x42   : > { %s575_s10 = sshll.u32 %s574_s27, 4  ;;  %s621_s1 = scalar_lea.hbm %s4441_s8, %s3547_s21  ;;  %s576_s10 = int_to_ptr.hbm [resolvable:$true] %s575_s10 }
  0x43   : > { %2933 = dma.hbm_to_vmem [thread:$0]  (!%p3738_p7), %s576_s10, 1024, %s578_s3, %s4391_s11, %s4392_s15, %s4392_s15, %s4394_s7  }
  0x44   : > { %s623_s27 = sshll.u32 %s621_s1, 4  ;;  %s625_s26 = sshll.u32 %s618_s19, 4  ;;  %s624_s27 = int_to_ptr.hbm [resolvable:$true] %s623_s27  ;;  %s626_s26 = int_to_ptr.vmem [resolvable:$true] %s625_s26 }
  0x45   : > { %s4390_s5 = scalar_lea.sflag [#allocation17], %s3721_s14  ;;  %s3796_s3 = sadd.s32 4294967295, %s3555_s23  }
  0x46   : > { %2939 = dma.hbm_to_vmem [thread:$0]  (!%p3738_p7), %s624_s27, 16, %s626_s26, %s4390_s5  }
  0x47   : > { %s2502_s10 = sadd.s32 4294967294, %s3555_s23   ;;  %s57_s24 = sadd.s32 1, %s3551_s22 }
  0x48   : > { %s4496_s24 = smov (!%p3698_p1, %s57_s24), %s3551_s22  ;;  %p77_p12 = scmp.ne.s32.totalorder %s3531_s17, %s3527_s16 }
  0x49   : > { %p59_p13 = scmp.ge.s32.totalorder %s4496_s24, 2  ;;  %p78_p2 = scmp.eq.s32.totalorder %s3796_s3, 0 }
  0x4a   : > { %p3811_p4 = por %p72_p0, %p71_p11  ;;  %p439_p6 = scmp.eq.s32.totalorder %s3796_s3, 3 }
  0x4b   : > { %s4498_s24 = smov (%p59_p13, %s4496_s24), 0  ;;  %p3821_p8 = por %p78_p2, %p77_p12 }
  0x4c   : > { %4443 = sst [smem:[#allocation41_spill]] %s4498_s24  ;;  %p3828_p1 = por %p103_p3, %p78_p2 }
  0x4d   : > { %s61_s27 = ssub.s32 %s3551_s22, %s4498_s24  ;;  %p3834_p0 = por %p439_p6, %p71_p11 }
  0x4e   : > { %s4445_s1 = scalar_select %p3828_p1, 1, 0 }
  0x4f   : > { %p62_p9 = scmp.eq.s32.totalorder %s61_s27, 0  ;;  %p445_p13 = scmp.eq.s32.totalorder %s2502_s10, 3 }
  0x50   : > { %4446 = sst [smem:[#allocation42_spill]] %s4445_s1  ;;  %s465_s5 = sand.u32 1, %s3535_s18  }
  0x51   : > { %s2811_s11 = sshll.u32 %s3551_s22, 3  ;;  %p3846_p3 = por %p445_p13, %p77_p12 }
  0x52   : > { %s3841_s15 = scalar_select %p62_p9, %s3535_s18, %s64_s13  }
  0x53   : > { %s4449_s29 = scalar_select %p3846_p3, 1, 0 }
  0x54   : > { %4448 = sst [smem:[#allocation43_spill]] %s3841_s15  ;;  %s2505_s7 = sshll.u32 %s465_s5, 3 }
  0x55   : > { %4450 = sst [smem:[#allocation44_spill]] %s4449_s29  ;;  %s469_s10 = scalar_lea.vmem [#allocation4], %s2505_s7 }
  0x56   : > { %s4451_s0 = sld [smem:[#allocation45_spill]]  ;;  %s477_s22 = sshll.u32 %s469_s10, 4  ;;  %s478_s22 = int_to_ptr.vmem [resolvable:$true] %s477_s22 }
  0x57   : > { %p2916_p11 = pnand %p2950_p5, %p3811_p4  ;;  %s4452_s2 = sld [smem:[#allocation47_spill]] }
  0x58   : > { %s4453_s24 = smov 4   ;;  %s507_s7 = scalar_lea.vmem [#allocation9], %s3724_s20 }
  0x59   : > { %s514_s10 = sshll.u32 %s507_s7, 4  ;;  %s4455_s26 = scalar_lea.sflag [#allocation8], %s3721_s14  ;;  %s515_s10 = int_to_ptr.vmem [resolvable:$true] %s514_s10 }
  0x5a   : > { %s4456_s4 = sld [smem:[#allocation49_spill]]  ;;  %s591_s7 = scalar_lea.vmem [#allocation15], %s3754_s9 }
  0x5b   : > { %s4458_s6 = sld [smem:[#allocation51_spill]]  ;;  %s2520_s15 = sshll.u32 %s3724_s20, 7 }
  0x5c   : > { %s474_s1 = scalar_lea.hbm %s4451_s0, %s2811_s11  ;;  %s466_s11 = scalar_lea.sflag [#allocation5], %s465_s5 }
  0x5d   : > { %s475_s27 = sshll.u32 %s474_s1, 4  ;;  %s510_s18 = scalar_lea.hbm %s4452_s2, %s3547_s21  ;;  %s476_s27 = int_to_ptr.hbm [resolvable:$true] %s475_s27 }
  0x5e   : > { %s512_s8 = sshll.u32 %s510_s18, 4  ;;  %s4454_s1 = smov 64   ;;  %s513_s8 = int_to_ptr.hbm [resolvable:$true] %s512_s8 }
  0x5f   : > { %2918 = dma.hbm_to_vmem [thread:$0]  (!%p2916_p11), %s476_s27, 128, %s478_s22, %s466_s11, %s4454_s1, %s4454_s1, %s4453_s24  }
  0x60   : > { %2924 = dma.hbm_to_vmem [thread:$0]  (!%p3738_p7), %s513_s8, 16, %s515_s10, %s4455_s26  }
  0x61   : > { %s552_s18 = scalar_lea.hbm %s4456_s4, %s3757_s12  ;;  %s547_s5 = scalar_lea.vmem [#allocation12], %s3754_s9 }
  0x62   : > { %s555_s0 = sshll.u32 %s547_s5, 4  ;;  %s553_s2 = sshll.u32 %s552_s18, 4  ;;  %s556_s0 = int_to_ptr.vmem [resolvable:$true] %s555_s0  ;;  %s554_s2 = int_to_ptr.hbm [resolvable:$true] %s553_s2 }
  0x63   : > { %s4457_s22 = scalar_lea.sflag [#allocation11], %s3721_s14  ;;  %s596_s8 = scalar_lea.hbm %s4458_s6, %s3757_s12 }
  0x64   : > { %2930 = dma.hbm_to_vmem [thread:$0]  (!%p3738_p7), %s554_s2, 1024, %s556_s0, %s4457_s22, %s4454_s1, %s4454_s1, %s4453_s24  }
  0x65   : > { %s599_s10 = sshll.u32 %s591_s7, 4  ;;  %s597_s26 = sshll.u32 %s596_s8, 4  ;;  %s600_s10 = int_to_ptr.vmem [resolvable:$true] %s599_s10  ;;  %s598_s26 = int_to_ptr.hbm [resolvable:$true] %s597_s26 }
  0x66   : > { %s4459_s13 = scalar_lea.sflag [#allocation14], %s3721_s14  ;;  %s2816_s18 = sshll.u32 %s3547_s21, 7 }
  0x67   : > { %2936 = dma.hbm_to_vmem [thread:$0]  (!%p3738_p7), %s598_s26, 1024, %s600_s10, %s4459_s13, %s4454_s1, %s4454_s1, %s4453_s24  }
  0x68   : > { %s4460_s5 = sld [smem:[#allocation55_spill]]  ;;  %s642_s9 = scalar_lea.vmem [#allocation18], %s2520_s15 }
  0x69   : > { %s650_s22 = sshll.u32 %s642_s9, 4  ;;  %s3559_s11 = smov 128   ;;  %s651_s22 = int_to_ptr.vmem [resolvable:$true] %s650_s22 }
  0x6a   : > { %s3560_s8 = smov 8   ;;  %s4461_s7 = scalar_lea.sflag [#allocation17], %s3721_s14 }
  0x6b   : > { %s4462_s10 = sld [smem:[#allocation57_spill]]  ;;  %s671_s21 = scalar_lea.vmem [#allocation19], %s2520_s15 }
  0x6c   : > { %s679_s0 = sshll.u32 %s671_s21, 4  ;;  %s668_s2 = scalar_lea.sflag [#allocation20], %s3724_s20  ;;  %s680_s0 = int_to_ptr.vmem [resolvable:$true] %s679_s0 }
  0x6d   : > { %s3914_s14 = sand.u32 (!%p3749_p10), 1, %s3531_s17  }
  0x6e   : > { %s647_s12 = scalar_lea.hbm %s4460_s5, %s2816_s18  ;;  %s4402_s4 = sshll.u32 (!%p3749_p10), %s3914_s14, 3 }
  0x6f   : > { %s648_s27 = sshll.u32 %s647_s12, 4  ;;  %697 = sbr.rel (%p3749_p10) target bundleno = 2216 (0x8a8), region = 76  ;;  %s649_s27 = int_to_ptr.hbm [resolvable:$true] %s648_s27 }
  0x70   : > { %2942 = dma.hbm_to_vmem [thread:$0]  (!%p3738_p7), %s649_s27, 2048, %s651_s22, %s4461_s7, %s3559_s11, %s3559_s11, %s3560_s8  }
  0x71   : > { %s676_s26 = scalar_lea.hbm %s4462_s10, %s2816_s18  ;;  %s700_s6 = scalar_lea.sflag (!%p3749_p10), [#allocation5], %s3914_s14 }
  0x72   : > { %s677_s13 = sshll.u32 %s676_s26, 4  ;;  %s3920_s21 = scalar_lea.vmem (!%p3749_p10), [#allocation4], %s4402_s4  ;;  %s678_s13 = int_to_ptr.hbm [resolvable:$true] %s677_s13 }
  0x73   : > { %2945 = dma.hbm_to_vmem [thread:$0]  (!%p3738_p7), %s678_s13, 2048, %s680_s0, %s668_s2, %s4454_s1, %s4454_s1, %s4453_s24  }
  0x74   : > { %3486 = dma.done.wait (%p3821_p8), %s700_s6, 128  }
  0x75   : > { %3488 = vsyncadd (%p3821_p8), %s700_s6, 4294967168  ;;  %s709_s28 = sand.u32 1, %s3796_s3   ;;  %s3928_s24 = sand.u32 1, %s3519_s30  }
  0x76   : > { %s710_s1 = scalar_lea.sflag [#allocation8], %s709_s28 }
  0x77   : > { %3490 = dma.done.wait (%p3828_p1), %s710_s1, 32  }
  0x78   : > { %3492 = vsyncadd (%p3828_p1), %s710_s1, 4294967264  ;;  %s2528_s18 = sshll.u32 %s3928_s24, 6  ;;  %s728_s12 = scalar_lea.sflag [#allocation11], %s709_s28 }
  0x79   : > { %s3937_s9 = scalar_lea.vmem [#allocation10], %s2528_s18 }
  0x7a   : > { %3494 = dma.done.wait (%p3828_p1), %s728_s12, 2048  }
  0x7b   : > { %3496 = vsyncadd (%p3828_p1), %s728_s12, 4294965248  ;;  %s3943_s3 = scalar_lea.vmem [#allocation12], %s2528_s18  ;;  %s748_s22 = scalar_lea.sflag [#allocation14], %s709_s28 }
  0x7c   : > { %s3945_s27 = scalar_lea.vmem [#allocation13], %s2528_s18 }
  0x7d   : > { %3498 = dma.done.wait (%p3828_p1), %s748_s22, 2048  }
  0x7e   : > { %3500 = vsyncadd (%p3828_p1), %s748_s22, 4294965248  ;;  %s3951_s11 = scalar_lea.vmem [#allocation15], %s2528_s18  ;;  %s768_s8 = scalar_lea.sflag [#allocation17], %s709_s28 }
  0x7f   : > { %3502 = dma.done.wait (%p3828_p1), %s768_s8, 2064  }
  0x80   : > { %3504 = vsyncadd (%p3828_p1), %s768_s8, 4294965232  ;;  %s2532_s10 = sshll.u32 %s3928_s24, 7  ;;  %s787_s13 = scalar_lea.sflag [#allocation20], %s3928_s24 }
  0x81   : > { %s3959_s26 = scalar_lea.vmem [#allocation18], %s2532_s10  ;;  %s3962_s0 = scalar_lea.vmem [#allocation19], %s2532_s10 }
  0x82   : > { %3506 = dma.done.wait (%p3828_p1), %s787_s13, 2048  }
  0x83   : > { %3508 = vsyncadd (%p3828_p1), %s787_s13, 4294965248  ;;  %s4465_s2 = sld [smem:[#allocation34_spill]]  ;;  %s4470_s16 = sshll.u32 %s3914_s14, 3 }
  0x84   : > { %s4466_s1 = sld [smem:[#allocation52_spill]]  ;;  %s3992_s6 = scalar_lea.vmem [#allocation21], %s4470_s16 }
  0x85   : > { %s4467_s8 = sld [smem:[#allocation54_spill]] }
  0x86   : > { %s4468_s25 = sld [smem:[#allocation58_spill]] }
  0x87   : > { %s4469_s30 = sld [smem:[#allocation56_spill]] }
  0x89   : > { %p891_p5 = scmp.lt.s32.totalorder %s4465_s2, 1  ;;  %p2536_p7 = scmp.ne.s32.totalorder %s4465_s2, 0 }
  0x8b   : > { %s3970_s5 = scalar_select %p891_p5, %s4465_s2, 1 }
  0x8c   : > { %908 = sbr.rel (%p2536_p7) target bundleno = 150 (0x96), region = 120 }
  0x8d   : > { %s893_s18 = scalar_lea.vmem %s4466_s1, %s3970_s5  ;;  %s896_s10 = scalar_lea.vmem %s4467_s8, %s3970_s5 }
  0x8e   : > { %s2535_s20 = sshll.u32 %s3970_s5, 1  ;;  %s903_s15 = scalar_lea.vmem %s4468_s25, %s3970_s5 }
  0x8f   : > { %s3988_s29 = scalar_lea.vmem %s4469_s30, %s2535_s20 }
  0x91   : > { %v2885_v0 = vld [vmem:[%s3920_s21] sm:$0xff]  }
  0x92   : > { %v2886_v1 = vunpack.c.l.bf16 %v2885_v0  ;;  %v2887_v2 = vunpack.c.h.bf16 %v2885_v0 }
  0x94   : > { %913 = vst [vmem:[#allocation2] sm:$0xff] %v2886_v1 }
  0x95   : > { %914 = vst [vmem:[#allocation2 + $0x8] sm:$0xff] %v2887_v2 }
  0x96 PF: > { %v3561_v5 = vmov 128.0   ;;  %v2825_v20 = vld [vmem:[%s3937_s9 + $0x38] sm:$0xff]  ;;  %v2824_v23 = vld [vmem:[%s3937_s9 + $0x30] sm:$0xff]  ;;  %v2823_v26 = vld [vmem:[%s3937_s9 + $0x28] sm:$0xff]  ;;  %s4471_s30 = scalar_lea.vmem [#allocation7], %s3928_s24  ;;  %s4472_s16 = scalar_lea.vmem [#allocation9], %s3928_s24 }
  0x97   : > { %3055 = vrcp.f32 %v3561_v5  ;;  %v2833_v21 = vld [vmem:[%s3943_s3 + $0x38] sm:$0xff]  ;;  %1041 = vmatpush.bf16.msra.mxu0 %v2825_v20  ;;  %v2832_v24 = vld [vmem:[%s3943_s3 + $0x30] sm:$0xff]  ;;  %v2831_v27 = vld [vmem:[%s3943_s3 + $0x28] sm:$0xff]  ;;  %vm1229_vm7 = vcmask 261120   ;;  %s3562_s17 = smov 96   ;;  %s3563_s4 = smov 32  }
  0x98   : > { %v2841_v22 = vld [vmem:[%s3945_s27 + $0x38] sm:$0xff]  ;;  %1119 = vmatpush.bf16.msra.mxu1 %v2833_v21  ;;  %v2840_v25 = vld [vmem:[%s3945_s27 + $0x30] sm:$0xff]  ;;  %v2839_v28 = vld [vmem:[%s3945_s27 + $0x28] sm:$0xff]  ;;  %vm1250_vm8 = vcmask 130048   ;;  %s3564_s21 = smov 64   ;;  %vm1305_vm9 = vcmask 257024  }
  0x99   : > { %1197 = vmatpush.bf16.msra.mxu2 %v2841_v22  ;;  %v2822_v29 = vld [vmem:[%s3937_s9 + $0x20] sm:$0xff]  ;;  %v2821_v32 = vld [vmem:[%s3937_s9 + $0x18] sm:$0xff]  ;;  %v2820_v35 = vld [vmem:[%s3937_s9 + $0x10] sm:$0xff]  ;;  %vm1391_vm10 = vcmask 519424   ;;  %vm1477_vm11 = vcmask 781824   ;;  %vm1563_vm12 = vcmask 1044224  }
  0x9a   : > { %v2830_v30 = vld [vmem:[%s3943_s3 + $0x20] sm:$0xff]  ;;  %v2829_v33 = vld [vmem:[%s3943_s3 + $0x18] sm:$0xff]  ;;  %v2828_v36 = vld [vmem:[%s3943_s3 + $0x10] sm:$0xff]  ;;  %s4477_s2 = sld [smem:[#allocation34_spill]] }
  0x9b   : > { %v3996_v3 = vld [vmem:[#allocation2] sm:$0xff]  ;;  %1042 = vmatpush.bf16.msra.mxu0 %v2824_v23  ;;  %v2838_v31 = vld [vmem:[%s3945_s27 + $0x20] sm:$0xff]  ;;  %v2819_v38 = vld [vmem:[%s3937_s9 + $0x8] sm:$0xff] }
  0x9c   : > { %919 = vadd.xlane.f32.xlu0 %v3996_v3  ;;  %v3999_v4 = vld [vmem:[#allocation2 + $0x8] sm:$0xff]  ;;  %1120 = vmatpush.bf16.msra.mxu1 %v2832_v24  ;;  %v2836_v37 = vld [vmem:[%s3945_s27 + $0x10] sm:$0xff]  ;;  %v2827_v39 = vld [vmem:[%s3943_s3 + $0x8] sm:$0xff] }
  0x9d   : > { %v3056_v6 = vpop.eup %3055  ;;  %1198 = vmatpush.bf16.msra.mxu2 %v2840_v25  ;;  %v2837_v34 = vld [vmem:[%s3945_s27 + $0x18] sm:$0xff]  ;;  %v2835_v40 = vld [vmem:[%s3945_s27 + $0x8] sm:$0xff]  ;;  %v2818_v42 = vld [vmem:[%s3937_s9] sm:$0xff] }
  0x9e   : > { %v924_v7 = vmul.f32 128.0, %v3056_v6  ;;  %vm928_vm0 = vweird.f32 %v3056_v6  ;;  %v2826_v43 = vld [vmem:[%s3943_s3] sm:$0xff]  ;;  %v3049_v63 = vld [vmem:[%s4471_s30] ss:$0 sm:$0xff] }
  0x9f   : > { %1043 = vmatpush.bf16.msra.mxu0 %v2823_v26  ;;  %v2834_v45 = vld [vmem:[%s3945_s27] sm:$0xff]  ;;  %s4474_s27 = scalar_lea.vmem [#allocation16], %s3928_s24 }
  0xa0   : > { %v925_v8 = vsub.f32 1.0, %v924_v7  ;;  %1121 = vmatpush.bf16.msra.mxu1 %v2831_v27  ;;  %p2805_p10 = scmp.ne.s32.totalorder %s4477_s2, 1 }
  0xa1   : > { %1199 = vmatpush.bf16.msra.mxu2 %v2839_v28 }
  0xa2   : > { %v926_v9 = vmul.f32 %v3056_v6, %v925_v8 }
  0xa3   : > { %1044 = vmatpush.bf16.msra.mxu0 %v2822_v29 }
  0xa4   : > { %921 = vadd.xlane.f32.xlu0 %v3999_v4  ;;  %v927_v10 = vadd.f32 %v3056_v6, %v926_v9  ;;  %1122 = vmatpush.bf16.msra.mxu1 %v2830_v30 }
  0xa5   : > { %1200 = vmatpush.bf16.msra.mxu2 %v2838_v31 }
  0xa6   : > { %v4002_v11 = vsel %vm928_vm0, %v3056_v6, %v927_v10  ;;  %v3050_v6 = vld [vmem:[%s4472_s16] ss:$0 sm:$0xff] }
  0xa7   : > { %1045 = vmatpush.bf16.msra.mxu0 %v2821_v32 }
  0xa8   : > { %1123 = vmatpush.bf16.msra.mxu1 %v2829_v33 }
  0xa9   : > { %1201 = vmatpush.bf16.msra.mxu2 %v2837_v34 }
  0xab   : > { %1046 = vmatpush.bf16.msra.mxu0 %v2820_v35 }
  0xac   : > { %1124 = vmatpush.bf16.msra.mxu1 %v2828_v36 }
  0xad   : > { %1202 = vmatpush.bf16.msra.mxu2 %v2836_v37 }
  0xaf   : > { %1047 = vmatpush.bf16.msra.mxu0 %v2819_v38 }
  0xb0   : > { %1125 = vmatpush.bf16.msra.mxu1 %v2827_v39 }
  0xb1   : > { %1203 = vmatpush.bf16.msra.mxu2 %v2835_v40 }
  0xb3   : > { %1048 = vmatpush.bf16.msra.mxu0 %v2818_v42 }
  0xb4   : > { %1126 = vmatpush.bf16.msra.mxu1 %v2826_v43 }
  0xb5   : > { %1204 = vmatpush.bf16.msra.mxu2 %v2834_v45 }
 0x10f   : > { %v920_v12 = vpop.xlane.xlu0 %919 }
 0x110   : > { %v930_v13 = vmul.f32 %v4002_v11, %v920_v12 }
 0x112   : > { %v4006_v14 = vsub.f32 %v3996_v3, %v930_v13 }
 0x114   : > { %v934_v15 = vmul.f32 %v4006_v14, %v4006_v14 }
 0x116   : > { %936 = vadd.xlane.f32.xlu1 %v934_v15 }
 0x117   : > { %v922_v16 = vpop.xlane.xlu0 %921 }
 0x118   : > { %v931_v17 = vmul.f32 %v4002_v11, %v922_v16 }
 0x11a   : > { %v4012_v18 = vsub.f32 %v3999_v4, %v931_v17 }
 0x11c   : > { %v935_v19 = vmul.f32 %v4012_v18, %v4012_v18 }
 0x11e   : > { %938 = vadd.xlane.f32.xlu1 %v935_v19 }
 0x189   : > { %v937_v41 = vpop.xlane.xlu1 %936 }
 0x18a   : > { %v940_v44 = vmul.f32 %v937_v41, %v4002_v11 }
 0x18c   : > { %v942_v46 = vadd.f32 1e-05, %v940_v44 }
 0x18e   : > { %3057 = vrsqrt.f32 %v942_v46  ;;  %vm950_vm2 = vweird.f32 %v942_v46 }
 0x191   : > { %v939_v47 = vpop.xlane.xlu1 %938 }
 0x192   : > { %v941_v48 = vmul.f32 %v939_v47, %v4002_v11 }
 0x194   : > { %v3058_v49 = vpop.eup %3057  ;;  %v943_v50 = vadd.f32 1e-05, %v941_v48 }
 0x195   : > { %v945_v51 = vmul.f32 %v3058_v49, %v942_v46  ;;  %vm951_vm1 = vweird.f32 %v3058_v49 }
 0x196   : > { %3059 = vrsqrt.f32 %v943_v50  ;;  %vm952_vm3 = vmor %vm950_vm2, %vm951_vm1  ;;  %vm960_vm5 = vweird.f32 %v943_v50 }
 0x197   : > { %v946_v52 = vmul.f32 %v3058_v49, %v945_v51 }
 0x199   : > { %v947_v53 = vmul.f32 0.5, %v946_v52 }
 0x19b   : > { %v948_v54 = vsub.f32 1.5, %v947_v53 }
 0x19c   : > { %v3060_v55 = vpop.eup %3059 }
 0x19d   : > { %v949_v56 = vmul.f32 %v3058_v49, %v948_v54  ;;  %v955_v57 = vmul.f32 %v3060_v55, %v943_v50  ;;  %vm961_vm4 = vweird.f32 %v3060_v55 }
 0x19e   : > { %vm962_vm6 = vmor %vm960_vm5, %vm961_vm4 }
 0x19f   : > { %v956_v58 = vmul.f32 %v3060_v55, %v955_v57  ;;  %v953_v59 = vsel %vm952_vm3, %v3058_v49, %v949_v56 }
 0x1a0   : > { %v964_v62 = vmul.f32 %v953_v59, %v4006_v14 }
 0x1a1   : > { %v957_v60 = vmul.f32 0.5, %v956_v58 }
 0x1a2   : > { %v969_v5 = vmul.f32 %v3049_v63, %v964_v62 }
 0x1a3   : > { %v958_v61 = vsub.f32 1.5, %v957_v60 }
 0x1a4   : > { %v974_v8 = vadd.f32 %v3050_v6, %v969_v5 }
 0x1a5   : > { %v959_v0 = vmul.f32 %v3060_v55, %v958_v61 }
 0x1a7   : > { %v963_v1 = vsel %vm962_vm6, %v3060_v55, %v959_v0 }
 0x1a8   : > { %v965_v2 = vmul.f32 %v963_v1, %v4012_v18 }
 0x1aa   : > { %v970_v7 = vmul.f32 %v3049_v63, %v965_v2 }
 0x1ac   : > { %v975_v9 = vadd.f32 %v3050_v6, %v970_v7 }
 0x1ae   : > { %v976_v10 = vpack.c.bf16 %v975_v9, %v974_v8 }
 0x1b0   : > { %1049 = vmatmul.bf16.vlgmr.msra.gmra.mxu0 %v976_v10  ;;  %1127 = vmatmul.bf16.vlgmr.msra.gmra.mxu1 %v976_v10 }
 0x1b1   : > { %1205 = vmatmul.bf16.vlgmr.msra.gmra.mxu2 %v976_v10 }
 0x22d   : > { %v1050_v12 = vpop.f32.mrf.mxu0  ;;  %v1128_v13 = vpop.f32.mrf.mxu1 }
 0x22e   : > { %v1211_v14 = vmul.f32 0.17677669, %v1050_v12  ;;  %v1215_v15 = vpack.c.bf16 %v1128_v13, %v1128_v13 }
 0x230   : > { %v1213_v20 = vpack.c.bf16 %v1211_v14, %v1211_v14  ;;  %v1226_v22 = vunpack.c.l.b16 %v1215_v15 }
 0x232   : > { %v1221_v25 = vunpack.c.l.b16 %v1213_v20 }
 0x234   : > { %v1206_v16 = vpop.f32.mrf.mxu2 }
 0x235   : > { %v1052_v17 = vpop.f32.mrf.mxu0  ;;  %v1130_v19 = vpop.f32.mrf.mxu1  ;;  %v1217_v28 = vpack.c.bf16 %v1206_v16, %v1206_v16 }
 0x236   : > { %v1212_v21 = vmul.f32 0.17677669, %v1052_v17  ;;  %v1216_v18 = vpack.c.bf16 %v1130_v19, %v1130_v19 }
 0x237   : > { %v1278_v33 = vunpack.c.l.b16 %v1217_v28 }
 0x238   : > { %v1214_v23 = vpack.c.bf16 %v1212_v21, %v1212_v21  ;;  %v1227_v24 = vunpack.c.l.b16 %v1216_v18 }
 0x23a   : > { %v1222_v26 = vunpack.c.l.b16 %v1214_v23  ;;  %v1228_v27 = vpack.c.b16 %v1227_v24, %v1226_v22 }
 0x23c   : > { %v1223_v29 = vpack.c.b16 %v1222_v26, %v1221_v25  ;;  %v1208_v30 = vpop.f32.mrf.mxu2  ;;  %1310 = vrot.lane.b32.xlu0 %v1228_v27, %s3562_s17  ;;  %v1234_v31 = vsel %vm1229_vm7, %v1228_v27, 0 }
 0x23d   : > { %v1218_v32 = vpack.c.bf16 %v1208_v30, %v1208_v30  ;;  %1243 = vmatpush.bf16.xpose.msra.mxu3 %v1234_v31 }
 0x23e   : > { %1308 = vrot.lane.b32.xlu1 %v1223_v29, %s3562_s17 }
 0x23f   : > { %v1279_v34 = vunpack.c.l.b16 %v1218_v32 }
 0x241   : > { %v4051_v35 = vpack.c.b16 %v1279_v34, %v1278_v33 }
 0x244   : > { %1482 = vrot.lane.b32.xlu0 %v1228_v27, %s3563_s4  ;;  %2633 = vmatmul.msk.bf16.vlgmr.msra.gmra.mxu3 %vm1229_vm7, %v1223_v29 }
 0x245   : > { %1292 = vmatpush.bf16.msrb.mxu3 %v4051_v35 }
 0x246   : > { %1480 = vrot.lane.b32.xlu1 %v1223_v29, %s3563_s4 }
 0x2ae   : > { %v1311_v36 = vpop.permute.xlu0 %1310 }
 0x2af   : > { %v1316_v37 = vsel %vm1229_vm7, %v1311_v36, 0 }
 0x2b0   : > { %1325 = vmatpush.bf16.xpose.msra.mxu3 %v1316_v37  ;;  %v1309_v60 = vpop.permute.xlu1 %1308 }
 0x2b6   : > { %v1483_v56 = vpop.permute.xlu0 %1482 }
 0x2b7   : > { %v1488_v59 = vsel %vm1229_vm7, %v1483_v56, 0 }
 0x2b8   : > { %v1481_v61 = vpop.permute.xlu1 %1480 }
 0x2c7   : > { %v1245_v38 = vpop.f32.mrf.mxu3 }
 0x2c8   : > { %v1251_v39 = vsel %vm1250_vm8, %v1245_v38, -inf }
 0x2c9   : > { %1252 = vmax.xlane.f32.xlu2 %v1251_v39 }
 0x2cf   : > { %v1247_v40 = vpop.f32.mrf.mxu3 }
 0x2d0   : > { %v1254_v41 = vsel %vm1250_vm8, %v1247_v40, -inf }
 0x2d1   : > { %1255 = vmax.xlane.f32.xlu2 %v1254_v41 }
 0x2e9   : > { %1396 = vrot.lane.b32.xlu2 %v1228_v27, %s3564_s21 }
 0x2f1   : > { %1394 = vrot.lane.b32.xlu2 %v1223_v29, %s3564_s21 }
 0x33c   : > { %v1253_v42 = vpop.xlane.xlu2 %1252 }
 0x33d   : > { %v1257_v43 = vsub.f32 %v1245_v38, %v1253_v42 }
 0x33f   : > { %v1259_v44 = vmul.f32 1.442695, %v1257_v43 }
 0x341   : > { %3061 = vpow2.f32 %v1259_v44 }
 0x344   : > { %v1256_v45 = vpop.xlane.xlu2 %1255 }
 0x345   : > { %v1258_v46 = vsub.f32 %v1247_v40, %v1256_v45 }
 0x347   : > { %v1261_v47 = vmul.f32 1.442695, %v1258_v46  ;;  %v3062_v48 = vpop.eup %3061 }
 0x348   : > { %v1269_v51 = vpack.c.bf16 %v3062_v48, %v3062_v48  ;;  %v1263_v27 = vsel %vm1250_vm8, %v3062_v48, 0.0 }
 0x349   : > { %3063 = vpow2.f32 %v1261_v47 }
 0x34a   : > { %v1273_v54 = vunpack.c.l.b16 %v1269_v51 }
 0x34c   : > { %v1397_v49 = vpop.permute.xlu2 %1396 }
 0x34d   : > { %v1402_v50 = vsel %vm1229_vm7, %v1397_v49, 0 }
 0x34e   : > { %1411 = vmatpush.bf16.xpose.msrb.mxu2 %v1402_v50 }
 0x34f   : > { %v4063_v52 = vpop.eup %3063 }
 0x350   : > { %v1270_v53 = vpack.c.bf16 %v4063_v52, %v4063_v52 }
 0x352   : > { %v1274_v55 = vunpack.c.l.b16 %v1270_v53 }
 0x354   : > { %v1395_v57 = vpop.permute.xlu2 %1394  ;;  %v1275_v58 = vpack.c.b16 %v1274_v55, %v1273_v54  ;;  %v1266_v54 = vsel %vm1250_vm8, %v4063_v52, 0.0 }
 0x355   : > { %2637 = vmatmul.msk.bf16.vlgmr.msrb.gmra.mxu2 %vm1229_vm7, %v1395_v57 }
 0x356   : > { %2634 = vmatmul.msk.bf16.vlgmr.msrb.gmra.mxu3 %vm1250_vm8, %v1275_v58 }
 0x357   : > { %1497 = vmatpush.bf16.xpose.msrb.mxu3 %v1488_v59 }
 0x366   : > { %2635 = vmatmul.msk.bf16.vlgmr.msra.gmra.mxu3 %vm1229_vm7, %v1309_v60 }
 0x376   : > { %2639 = vmatmul.msk.bf16.vlgmr.msrb.gmra.mxu3 %vm1229_vm7, %v1481_v61 }
 0x3d8   : > { %v1413_v62 = vpop.f32.mrf.mxu2 }
 0x3d9   : > { %v4072_v63 = vpop.f32.mrf.mxu3  ;;  %v1418_v0 = vsel %vm1250_vm8, %v1413_v62, -inf }
 0x3da   : > { %1419 = vmax.xlane.f32.xlu1 %v1418_v0 }
 0x3e0   : > { %v1415_v1 = vpop.f32.mrf.mxu2 }
 0x3e1   : > { %v4075_v2 = vpop.f32.mrf.mxu3  ;;  %v1421_v5 = vsel %vm1250_vm8, %v1415_v1, -inf }
 0x3e2   : > { %1422 = vmax.xlane.f32.xlu0 %v1421_v5 }
 0x3e9   : > { %v1327_v6 = vpop.f32.mrf.mxu3 }
 0x3ea   : > { %v1332_v7 = vsel %vm1250_vm8, %v1327_v6, -inf }
 0x3eb   : > { %1333 = vmax.xlane.f32.xlu0 %v1332_v7 }
 0x3f1   : > { %v1329_v8 = vpop.f32.mrf.mxu3 }
 0x3f2   : > { %v1335_v9 = vsel %vm1250_vm8, %v1329_v8, -inf }
 0x3f3   : > { %1336 = vmax.xlane.f32.xlu2 %v1335_v9 }
 0x3f9   : > { %v1499_v10 = vpop.f32.mrf.mxu3 }
 0x3fa   : > { %v1504_v12 = vsel %vm1250_vm8, %v1499_v10, -inf }
 0x3fb   : > { %1505 = vmax.xlane.f32.xlu1 %v1504_v12 }
 0x401   : > { %v1501_v13 = vpop.f32.mrf.mxu3 }
 0x402   : > { %v1507_v14 = vsel %vm1250_vm8, %v1501_v13, -inf }
 0x403   : > { %1508 = vmax.xlane.f32.xlu0 %v1507_v14 }
 0x40b   : > { %1357 = vrot.lane.b32.xlu2 %v4051_v35, %s3562_s17 }
 0x414   : > { %1443 = vrot.lane.b32.xlu1 %v4051_v35, %s3564_s21 }
 0x417   : > { %1529 = vrot.lane.b32.xlu0 %v4051_v35, %s3563_s4 }
 0x44d   : > { %v1420_v15 = vpop.xlane.xlu1 %1419 }
 0x44e   : > { %v1424_v16 = vsub.f32 %v1413_v62, %v1420_v15 }
 0x450   : > { %v1426_v17 = vmul.f32 1.442695, %v1424_v16 }
 0x452   : > { %3065 = vpow2.f32 %v1426_v17 }
 0x455   : > { %v1423_v19 = vpop.xlane.xlu0 %1422 }
 0x456   : > { %v1425_v20 = vsub.f32 %v1415_v1, %v1423_v19 }
 0x458   : > { %v3066_v21 = vpop.eup %3065  ;;  %v1428_v18 = vmul.f32 1.442695, %v1425_v20 }
 0x459   : > { %v1430_v22 = vsel %vm1250_vm8, %v3066_v21, 0.0  ;;  %v1436_v53 = vpack.c.bf16 %v3066_v21, %v3066_v21 }
 0x45a   : > { %3067 = vpow2.f32 %v1428_v18  ;;  %1431 = vadd.xlane.f32.xlu1 %v1430_v22 }
 0x45b   : > { %v1440_v59 = vunpack.c.l.b16 %v1436_v53 }
 0x45e   : > { %v1334_v23 = vpop.xlane.xlu0 %1333 }
 0x45f   : > { %v1338_v24 = vsub.f32 %v1327_v6, %v1334_v23 }
 0x460   : > { %v3068_v25 = vpop.eup %3067 }
 0x461   : > { %v1340_v26 = vmul.f32 1.442695, %v1338_v24  ;;  %v1433_v28 = vsel %vm1250_vm8, %v3068_v25, 0.0  ;;  %v1437_v50 = vpack.c.bf16 %v3068_v25, %v3068_v25 }
 0x462   : > { %1264 = vadd.xlane.f32.xlu1 %v1263_v27  ;;  %1434 = vadd.xlane.f32.xlu2 %v1433_v28 }
 0x463   : > { %3069 = vpow2.f32 %v1340_v26  ;;  %v1441_v57 = vunpack.c.l.b16 %v1437_v50  ;;  %v2843_v50 = vld [vmem:[%s3951_s11] sm:$0xff] }
 0x465   : > { %v1442_v62 = vpack.c.b16 %v1441_v57, %v1440_v59 }
 0x466   : > { %v1337_v29 = vpop.xlane.xlu2 %1336 }
 0x467   : > { %v1339_v30 = vsub.f32 %v1329_v8, %v1337_v29 }
 0x469   : > { %v3070_v31 = vpop.eup %3069  ;;  %v1342_v32 = vmul.f32 1.442695, %v1339_v30 }
 0x46a   : > { %v1344_v33 = vsel %vm1250_vm8, %v3070_v31, 0.0  ;;  %v1350_v37 = vpack.c.bf16 %v3070_v31, %v3070_v31 }
 0x46b   : > { %3071 = vpow2.f32 %v1342_v32  ;;  %1345 = vadd.xlane.f32.xlu2 %v1344_v33 }
 0x46c   : > { %v1354_v42 = vunpack.c.l.b16 %v1350_v37 }
 0x46e   : > { %v1506_v34 = vpop.xlane.xlu1 %1505  ;;  %v1358_v35 = vpop.permute.xlu2 %1357 }
 0x46f   : > { %v1510_v36 = vsub.f32 %v1499_v10, %v1506_v34  ;;  %1370 = vmatpush.bf16.msrb.mxu0 %v1358_v35 }
 0x471   : > { %v3072_v38 = vpop.eup %3071  ;;  %v1512_v39 = vmul.f32 1.442695, %v1510_v36 }
 0x472   : > { %v1351_v40 = vpack.c.bf16 %v3072_v38, %v3072_v38  ;;  %v1347_v41 = vsel %vm1250_vm8, %v3072_v38, 0.0 }
 0x473   : > { %3073 = vpow2.f32 %v1512_v39  ;;  %1348 = vadd.xlane.f32.xlu0 %v1347_v41 }
 0x474   : > { %v1355_v43 = vunpack.c.l.b16 %v1351_v40 }
 0x476   : > { %v1509_v44 = vpop.xlane.xlu0 %1508  ;;  %v1356_v45 = vpack.c.b16 %v1355_v43, %v1354_v42  ;;  %v2850_v42 = vld [vmem:[%s3951_s11 + $0x38] sm:$0xff]  ;;  %v2849_v43 = vld [vmem:[%s3951_s11 + $0x30] sm:$0xff] }
 0x477   : > { %v1511_v46 = vsub.f32 %v1501_v13, %v1509_v44  ;;  %1642 = vmatpush.bf16.msrb.mxu1 %v2850_v42  ;;  %v2848_v44 = vld [vmem:[%s3951_s11 + $0x28] sm:$0xff] }
 0x478   : > { %2636 = vmatmul.msk.bf16.vlgmr.msrb.gmra.mxu0 %vm1250_vm8, %v1356_v45  ;;  %v2847_v45 = vld [vmem:[%s3951_s11 + $0x20] sm:$0xff] }
 0x479   : > { %v3074_v47 = vpop.eup %3073  ;;  %v1514_v48 = vmul.f32 1.442695, %v1511_v46 }
 0x47a   : > { %v1516_v49 = vsel %vm1250_vm8, %v3074_v47, 0.0  ;;  %v1522_v58 = vpack.c.bf16 %v3074_v47, %v3074_v47  ;;  %v2846_v47 = vld [vmem:[%s3951_s11 + $0x18] sm:$0xff] }
 0x47b   : > { %3075 = vpow2.f32 %v1514_v48  ;;  %1517 = vadd.xlane.f32.xlu2 %v1516_v49  ;;  %1643 = vmatpush.bf16.msrb.mxu1 %v2849_v43  ;;  %v2845_v48 = vld [vmem:[%s3951_s11 + $0x10] sm:$0xff]  ;;  %v2844_v49 = vld [vmem:[%s3951_s11 + $0x8] sm:$0xff] }
 0x47c   : > { %v1526_v0 = vunpack.c.l.b16 %v1522_v58  ;;  %v3051_v58 = vld [vmem:[%s893_s18] ss:$0 sm:$0xff]  ;;  %v2697_v43 = vld [vmem:[%s3959_s26 + $0x28] sm:$0xf0] }
 0x47f   : > { %1644 = vmatpush.bf16.msrb.mxu1 %v2848_v44 }
 0x481   : > { %v3076_v51 = vpop.eup %3075 }
 0x482   : > { %v1519_v55 = vsel %vm1250_vm8, %v3076_v51, 0.0  ;;  %v1523_v56 = vpack.c.bf16 %v3076_v51, %v3076_v51 }
 0x483   : > { %1267 = vadd.xlane.f32.xlu2 %v1266_v54  ;;  %1520 = vadd.xlane.f32.xlu0 %v1519_v55 }
 0x484   : > { %v1527_v61 = vunpack.c.l.b16 %v1523_v56  ;;  %1645 = vmatpush.bf16.msrb.mxu1 %v2847_v45  ;;  %v2687_v45 = vld [vmem:[%s3959_s26 + $0x10] sm:$0xf] }
 0x486   : > { %v1444_v60 = vpop.permute.xlu1 %1443  ;;  %v1528_v5 = vpack.c.b16 %v1527_v61, %v1526_v0 }
 0x487   : > { %1456 = vmatpush.bf16.msra.mxu2 %v1444_v60 }
 0x488   : > { %1646 = vmatpush.bf16.msrb.mxu1 %v2846_v47  ;;  %v2853_v47 = vld [vmem:[%s3959_s26 + $0x14] sm:$0xf] }
 0x489   : > { %v1530_v1 = vpop.permute.xlu0 %1529 }
 0x48a   : > { %2638 = vmatmul.msk.bf16.vlgmr.msra.gmra.mxu2 %vm1250_vm8, %v1442_v62  ;;  %1542 = vmatpush.bf16.msra.mxu0 %v1530_v1 }
 0x48c   : > { %1647 = vmatpush.bf16.msrb.mxu1 %v2845_v48 }
 0x48d   : > { %2640 = vmatmul.msk.bf16.vlgmr.msra.gmra.mxu0 %vm1250_vm8, %v1528_v5 }
 0x490   : > { %1648 = vmatpush.bf16.msrb.mxu1 %v2844_v49  ;;  %v2689_v49 = vld [vmem:[%s3959_s26 + $0x18] sm:$0xf0] }
 0x494   : > { %1649 = vmatpush.bf16.msrb.mxu1 %v2843_v50  ;;  %v2679_v50 = vld [vmem:[%s3959_s26] sm:$0xf] }
 0x4cd   : > { %v1432_v52 = vpop.xlane.xlu1 %1431 }
 0x4d5   : > { %v1265_v6 = vpop.xlane.xlu1 %1264  ;;  %v1435_v8 = vpop.xlane.xlu2 %1434 }
 0x4d6   : > { %3077 = vrcp.f32 %v1265_v6 }
 0x4dc   : > { %v3078_v7 = vpop.eup %3077 }
 0x4dd   : > { %v1301_v9 = vmul.f32 %v3078_v7, %v4072_v63 }
 0x4de   : > { %v1346_v12 = vpop.xlane.xlu2 %1345 }
 0x4df   : > { %v1303_v10 = vpack.c.bf16 %v1301_v9, %v1301_v9 }
 0x4e1   : > { %1306 = vst.msk [vmem:[#allocation3] sm:$0xf] %vm1305_vm9, %v1303_v10  ;;  %v2735_v10 = vld [vmem:[%s3959_s26 + $0x70] sm:$0xf] }
 0x4e6   : > { %v1349_v14 = vpop.xlane.xlu0 %1348 }
 0x4e7   : > { %3079 = vrcp.f32 %v1349_v14 }
 0x4ed   : > { %v3080_v17 = vpop.eup %3079 }
 0x4ee   : > { %v1518_v13 = vpop.xlane.xlu2 %1517 }
 0x4f5   : > { %v1372_v15 = vpop.f32.mrf.mxu0 }
 0x4f6   : > { %v1268_v16 = vpop.xlane.xlu2 %1267  ;;  %v1521_v34 = vpop.xlane.xlu0 %1520 }
 0x4f7   : > { %3081 = vrcp.f32 %v1268_v16 }
 0x4f8   : > { %3083 = vrcp.f32 %v1518_v13  ;;  %v2865_v13 = vld [vmem:[%s3959_s26 + $0x74] sm:$0xf] }
 0x4f9   : > { %3085 = vrcp.f32 %v1432_v52 }
 0x4fa   : > { %3087 = vrcp.f32 %v1435_v8 }
 0x4fb   : > { %3089 = vrcp.f32 %v1346_v12  ;;  %v2866_v12 = vld [vmem:[%s3959_s26 + $0x74] sm:$0xf0] }
 0x4fc   : > { %3091 = vrcp.f32 %v1521_v34  ;;  %v2736_v14 = vor.u32 %v2866_v12, %v2735_v10  ;;  %v2858_v34 = vld [vmem:[%s3959_s26 + $0x34] sm:$0xf0] }
 0x4fd   : > { %v1374_v19 = vpop.f32.mrf.mxu0  ;;  %v3082_v20 = vpop.eup %3081 }
 0x4fe   : > { %v1380_v21 = vmul.f32 %v3080_v17, %v1374_v19  ;;  %v1302_v18 = vmul.f32 %v3082_v20, %v4075_v2  ;;  %v3084_v63 = vpop.eup %3083  ;;  %1813 = vmatpush.bf16.msrb.mxu2 %v2736_v14  ;;  %v2727_v17 = vld [vmem:[%s3959_s26 + $0x60] sm:$0xf]  ;;  %v2864_v19 = vld [vmem:[%s3959_s26 + $0x64] sm:$0xf0]  ;;  %v2863_v20 = vld [vmem:[%s3959_s26 + $0x64] sm:$0xf] }
 0x4ff   : > { %v3086_v26 = vpop.eup %3085 }
 0x500   : > { %v1382_v22 = vpack.c.bf16 %v1380_v21, %v1380_v21  ;;  %v1304_v23 = vpack.c.bf16 %v1302_v18, %v1302_v18  ;;  %v3088_v2 = vpop.eup %3087  ;;  %v2728_v21 = vor.u32 %v2864_v19, %v2727_v17  ;;  %v2729_v18 = vld [vmem:[%s3959_s26 + $0x68] sm:$0xf0]  ;;  %v3052_v19 = vld [vmem:[%s4474_s27] ss:$0 sm:$0xff] }
 0x501   : > { %v3090_v35 = vpop.eup %3089 }
 0x502   : > { %1387 = vrot.lane.b32.xlu1 %v1382_v22, %s3563_s4  ;;  %1307 = vst.msk [vmem:[#allocation3 + $0x4] sm:$0xf] %vm1305_vm9, %v1304_v23  ;;  %v1379_v36 = vmul.f32 %v3090_v35, %v1372_v15  ;;  %v3092_v39 = vpop.eup %3091  ;;  %v2737_v15 = vld [vmem:[%s3959_s26 + $0x78] sm:$0xf0]  ;;  %v2732_v22 = vor.u32 %v2863_v20, %v2729_v18  ;;  %1814 = vmatpush.bf16.msrb.mxu2 %v2728_v21  ;;  %v2719_v23 = vld [vmem:[%s3959_s26 + $0x50] sm:$0xf] }
 0x503   : > { %v2740_v16 = vor.u32 %v2865_v13, %v2737_v15  ;;  %v2857_v35 = vld [vmem:[%s3959_s26 + $0x34] sm:$0xf] }
 0x504   : > { %v1381_v37 = vpack.c.bf16 %v1379_v36, %v1379_v36 }
 0x505   : > { %1827 = vmatpush.bf16.msra.mxu3 %v2740_v16 }
 0x509   : > { %1828 = vmatpush.bf16.msra.mxu3 %v2732_v22 }
 0x50a   : > { %v1544_v24 = vpop.f32.mrf.mxu0 }
 0x50b   : > { %v1551_v25 = vmul.f32 %v3084_v63, %v1544_v24  ;;  %v2862_v63 = vld [vmem:[%s3959_s26 + $0x54] sm:$0xf0]  ;;  %v2861_v24 = vld [vmem:[%s3959_s26 + $0x54] sm:$0xf] }
 0x50d   : > { %v1553_v27 = vpack.c.bf16 %v1551_v25, %v1551_v25  ;;  %v1458_v28 = vpop.f32.mrf.mxu2  ;;  %v2720_v25 = vor.u32 %v2862_v63, %v2719_v23  ;;  %v3053_v23 = vld [vmem:[%s896_s10] ss:$0 sm:$0xff] }
 0x50e   : > { %v1465_v29 = vmul.f32 %v3086_v26, %v1458_v28  ;;  %v2721_v26 = vld [vmem:[%s3959_s26 + $0x58] sm:$0xf0]  ;;  %v2711_v28 = vld [vmem:[%s3959_s26 + $0x40] sm:$0xf] }
 0x50f   : > { %1557 = vrot.lane.b32.xlu1 %v1553_v27, %s3562_s17  ;;  %v2724_v27 = vor.u32 %v2861_v24, %v2721_v26  ;;  %1815 = vmatpush.bf16.msrb.mxu2 %v2720_v25 }
 0x510   : > { %v1467_v30 = vpack.c.bf16 %v1465_v29, %v1465_v29  ;;  %v2860_v29 = vld [vmem:[%s3959_s26 + $0x44] sm:$0xf0] }
 0x511   : > { %1829 = vmatpush.bf16.msra.mxu3 %v2724_v27 }
 0x512   : > { %1471 = vrot.lane.b32.xlu2 %v1467_v30, %s3564_s21  ;;  %v1546_v38 = vpop.f32.mrf.mxu0  ;;  %v2859_v30 = vld [vmem:[%s3959_s26 + $0x44] sm:$0xf] }
 0x513   : > { %v1552_v40 = vmul.f32 %v3092_v39, %v1546_v38  ;;  %v2695_v39 = vld [vmem:[%s3959_s26 + $0x20] sm:$0xf] }
 0x515   : > { %v1460_v31 = vpop.f32.mrf.mxu2  ;;  %v1554_v41 = vpack.c.bf16 %v1552_v40, %v1552_v40  ;;  %v2856_v40 = vld [vmem:[%s3959_s26 + $0x24] sm:$0xf0] }
 0x516   : > { %v1466_v32 = vmul.f32 %v3088_v2, %v1460_v31  ;;  %v2712_v2 = vor.u32 %v2860_v29, %v2711_v28  ;;  %v2713_v31 = vld [vmem:[%s3959_s26 + $0x48] sm:$0xf0]  ;;  %v2696_v42 = vor.u32 %v2856_v40, %v2695_v39 }
 0x518   : > { %v1468_v33 = vpack.c.bf16 %v1466_v32, %v1466_v32  ;;  %v2716_v32 = vor.u32 %v2859_v30, %v2713_v31  ;;  %1816 = vmatpush.bf16.msrb.mxu2 %v2712_v2 }
 0x51a   : > { %1473 = vrot.lane.b32.xlu0 %v1468_v33, %s3564_s21  ;;  %1830 = vmatpush.bf16.msra.mxu3 %v2716_v32  ;;  %v2703_v33 = vld [vmem:[%s3959_s26 + $0x30] sm:$0xf] }
 0x51b   : > { %v2704_v36 = vor.u32 %v2858_v34, %v2703_v33 }
 0x51d   : > { %1817 = vmatpush.bf16.msrb.mxu2 %v2704_v36 }
 0x521   : > { %1818 = vmatpush.bf16.msrb.mxu2 %v2696_v42 }
 0x522   : > { %1385 = vrot.lane.b32.xlu0 %v1381_v37, %s3563_s4  ;;  %v2705_v37 = vld [vmem:[%s3959_s26 + $0x38] sm:$0xf0] }
 0x523   : > { %v2708_v38 = vor.u32 %v2857_v35, %v2705_v37 }
 0x525   : > { %1831 = vmatpush.bf16.msra.mxu3 %v2708_v38 }
 0x52a   : > { %1559 = vrot.lane.b32.xlu0 %v1554_v41, %s3562_s17  ;;  %v2855_v41 = vld [vmem:[%s3959_s26 + $0x24] sm:$0xf] }
 0x52b   : > { %v2700_v44 = vor.u32 %v2855_v41, %v2697_v43  ;;  %v2874_v43 = vld [vmem:[%s3962_s0 + $0x38] sm:$0xff] }
 0x52c   : > { %2139 = vmatpush.bf16.msrb.mxu0 %v2874_v43 }
 0x52d   : > { %1832 = vmatpush.bf16.msra.mxu3 %v2700_v44  ;;  %v2882_v44 = vld [vmem:[%s3962_s0 + $0x78] sm:$0xff] }
 0x52e   : > { %2153 = vmatpush.bf16.msra.mxu1 %v2882_v44 }
 0x56c   : > { %v1472_v54 = vpop.permute.xlu2 %1471 }
 0x574   : > { %v1388_v46 = vpop.permute.xlu1 %1387 }
 0x575   : > { %1393 = vst.msk [vmem:[#allocation3 + $0x4] sm:$0xf] %vm1391_vm10, %v1388_v46  ;;  %v2854_v46 = vld [vmem:[%s3959_s26 + $0x14] sm:$0xf0] }
 0x576   : > { %v2688_v48 = vor.u32 %v2854_v46, %v2687_v45 }
 0x578   : > { %1819 = vmatpush.bf16.msrb.mxu2 %v2688_v48 }
 0x581   : > { %v1558_v55 = vpop.permute.xlu1 %1557 }
 0x58c   : > { %v1474_v51 = vpop.permute.xlu0 %1473 }
 0x58d   : > { %1479 = vst.msk [vmem:[#allocation3 + $0x4] sm:$0xf] %vm1477_vm11, %v1474_v51  ;;  %v2852_v51 = vld [vmem:[%s3959_s26 + $0x4] sm:$0xf0] }
 0x594   : > { %v1386_v53 = vpop.permute.xlu0 %1385 }
 0x595   : > { %1392 = vst.msk [vmem:[#allocation3] sm:$0xf] %vm1391_vm10, %v1386_v53 }
 0x596   : > { %1478 = vst.msk [vmem:[#allocation3] sm:$0xf] %vm1477_vm11, %v1472_v54  ;;  %v2692_v54 = vor.u32 %v2853_v47, %v2689_v49  ;;  %v2873_v49 = vld [vmem:[%s3962_s0 + $0x30] sm:$0xff] }
 0x597   : > { %1564 = vst.msk [vmem:[#allocation3] sm:$0xf] %vm1563_vm12, %v1558_v55  ;;  %v2851_v55 = vld [vmem:[%s3959_s26 + $0x4] sm:$0xf]  ;;  %2140 = vmatpush.bf16.msrb.mxu0 %v2873_v49 }
 0x598   : > { %1833 = vmatpush.bf16.msra.mxu3 %v2692_v54 }
 0x59c   : > { %v1560_v56 = vpop.permute.xlu0 %1559 }
 0x59d   : > { %1565 = vst.msk [vmem:[#allocation3 + $0x4] sm:$0xf] %vm1563_vm12, %v1560_v56  ;;  %v2681_v56 = vld [vmem:[%s3959_s26 + $0x8] sm:$0xf0] }
 0x5a4   : > { %v2842_v57 = vld [vmem:[#allocation3] sm:$0xff] }
 0x5a5   : > { %1650 = vmatmul.bf16.vlgmr.msrb.gmra.mxu1 %v2842_v57 }
 0x622   : > { %v1651_v59 = vpop.f32.mrf.mxu1 }
 0x623   : > { %v1652_v60 = vadd.f32 %v3051_v58, %v1651_v59  ;;  %v2684_v59 = vor.u32 %v2851_v55, %v2681_v56  ;;  %v2872_v55 = vld [vmem:[%s3962_s0 + $0x28] sm:$0xff] }
 0x624   : > { %v2880_v56 = vld [vmem:[%s3962_s0 + $0x68] sm:$0xff]  ;;  %2141 = vmatpush.bf16.msrb.mxu0 %v2872_v55 }
 0x625   : > { %v4126_v61 = vadd.f32 %v1652_v60, %v3996_v3  ;;  %1834 = vmatpush.bf16.msra.mxu3 %v2684_v59 }
 0x627   : > { %1660 = vadd.xlane.f32.xlu2 %v4126_v61 }
 0x62a   : > { %v1653_v62 = vpop.f32.mrf.mxu1 }
 0x62b   : > { %v1654_v0 = vadd.f32 %v3051_v58, %v1653_v62  ;;  %v2680_v58 = vor.u32 %v2852_v51, %v2679_v50  ;;  %v2881_v50 = vld [vmem:[%s3962_s0 + $0x70] sm:$0xff] }
 0x62c   : > { %2154 = vmatpush.bf16.msra.mxu1 %v2881_v50 }
 0x62d   : > { %v4130_v1 = vadd.f32 %v1654_v0, %v3999_v4  ;;  %1820 = vmatpush.bf16.msrb.mxu2 %v2680_v58 }
 0x62f   : > { %1662 = vadd.xlane.f32.xlu1 %v4130_v1 }
 0x630   : > { %2155 = vmatpush.bf16.msra.mxu1 %v2880_v56  ;;  %v2868_v56 = vld [vmem:[%s3962_s0 + $0x8] sm:$0xff] }
 0x69a   : > { %v1661_v5 = vpop.xlane.xlu2 %1660 }
 0x69b   : > { %v1664_v52 = vmul.f32 %v1661_v5, %v4002_v11 }
 0x69d   : > { %v4135_v6 = vsub.f32 %v4126_v61, %v1664_v52 }
 0x69f   : > { %v1668_v3 = vmul.f32 %v4135_v6, %v4135_v6 }
 0x6a1   : > { %1670 = vadd.xlane.f32.xlu0 %v1668_v3 }
 0x6a2   : > { %v1663_v7 = vpop.xlane.xlu1 %1662 }
 0x6a3   : > { %v1665_v4 = vmul.f32 %v1663_v7, %v4002_v11 }
 0x6a5   : > { %v4141_v8 = vsub.f32 %v4130_v1, %v1665_v4 }
 0x6a7   : > { %v1669_v9 = vmul.f32 %v4141_v8, %v4141_v8 }
 0x6a9   : > { %1672 = vadd.xlane.f32.xlu2 %v1669_v9 }
 0x714   : > { %v1671_v53 = vpop.xlane.xlu0 %1670 }
 0x715   : > { %v1674_v57 = vmul.f32 %v1671_v53, %v4002_v11 }
 0x717   : > { %v1676_v60 = vadd.f32 1e-05, %v1674_v57 }
 0x719   : > { %3093 = vrsqrt.f32 %v1676_v60  ;;  %vm1684_vm14 = vweird.f32 %v1676_v60 }
 0x71c   : > { %v1673_v62 = vpop.xlane.xlu2 %1672 }
 0x71d   : > { %v1675_v0 = vmul.f32 %v1673_v62, %v4002_v11 }
 0x71f   : > { %v3094_v5 = vpop.eup %3093  ;;  %v1677_v52 = vadd.f32 1e-05, %v1675_v0 }
 0x720   : > { %v1679_v3 = vmul.f32 %v3094_v5, %v1676_v60  ;;  %vm1685_vm13 = vweird.f32 %v3094_v5 }
 0x721   : > { %3095 = vrsqrt.f32 %v1677_v52  ;;  %vm1686_vm15 = vmor %vm1684_vm14, %vm1685_vm13  ;;  %vm1694_vm1 = vweird.f32 %v1677_v52 }
 0x722   : > { %v1680_v7 = vmul.f32 %v3094_v5, %v1679_v3 }
 0x724   : > { %v1681_v4 = vmul.f32 0.5, %v1680_v7 }
 0x726   : > { %v1682_v9 = vsub.f32 1.5, %v1681_v4 }
 0x727   : > { %v3096_v10 = vpop.eup %3095 }
 0x728   : > { %v1683_v12 = vmul.f32 %v3094_v5, %v1682_v9  ;;  %v1689_v13 = vmul.f32 %v3096_v10, %v1677_v52  ;;  %vm1695_vm0 = vweird.f32 %v3096_v10 }
 0x729   : > { %vm1696_vm2 = vmor %vm1694_vm1, %vm1695_vm0 }
 0x72a   : > { %v1690_v14 = vmul.f32 %v3096_v10, %v1689_v13  ;;  %v1687_v15 = vsel %vm1686_vm15, %v3094_v5, %v1683_v12  ;;  %v2879_v12 = vld [vmem:[%s3962_s0 + $0x60] sm:$0xff] }
 0x72b   : > { %v1698_v11 = vmul.f32 %v1687_v15, %v4135_v6  ;;  %v1727_v6 = vld [vmem:[%s3988_s29] sm:$0x3]  ;;  %2156 = vmatpush.bf16.msra.mxu1 %v2879_v12 }
 0x72c   : > { %v1691_v16 = vmul.f32 0.5, %v1690_v14  ;;  %v1729_v27 = vperm.slane %v1727_v6, 0  ;;  %v1730_v28 = vperm.slane %v1727_v6, 1 }
 0x72d   : > { %v1703_v22 = vmul.f32 %v3052_v19, %v1698_v11 }
 0x72e   : > { %v1692_v17 = vsub.f32 1.5, %v1691_v16 }
 0x72f   : > { %v1708_v24 = vadd.f32 %v3053_v23, %v1703_v22 }
 0x730   : > { %v1693_v20 = vmul.f32 %v3096_v10, %v1692_v17 }
 0x732   : > { %v1697_v21 = vsel %vm1696_vm2, %v3096_v10, %v1693_v20  ;;  %v2871_v10 = vld [vmem:[%s3962_s0 + $0x20] sm:$0xff] }
 0x733   : > { %v1699_v18 = vmul.f32 %v1697_v21, %v4141_v8  ;;  %2142 = vmatpush.bf16.msrb.mxu0 %v2871_v10  ;;  %v2870_v21 = vld [vmem:[%s3962_s0 + $0x18] sm:$0xff] }
 0x735   : > { %v1704_v63 = vmul.f32 %v3052_v19, %v1699_v18  ;;  %v2878_v18 = vld [vmem:[%s3962_s0 + $0x58] sm:$0xff] }
 0x736   : > { %2157 = vmatpush.bf16.msra.mxu1 %v2878_v18 }
 0x737   : > { %v1709_v25 = vadd.f32 %v3053_v23, %v1704_v63  ;;  %2143 = vmatpush.bf16.msrb.mxu0 %v2870_v21 }
 0x739   : > { %v1710_v26 = vpack.c.bf16 %v1709_v25, %v1708_v24 }
 0x73b   : > { %1821 = vmatmul.bf16.vlgmr.msrb.gmra.mxu2 %v1710_v26  ;;  %1835 = vmatmul.bf16.vlgmr.msra.gmra.mxu3 %v1710_v26 }
 0x7be   : > { %v1822_v29 = vpop.f32.mrf.mxu2  ;;  %v1836_v30 = vpop.f32.mrf.mxu3 }
 0x7bf   : > { %v4189_v2 = vadd.f32 %v1822_v29, %v1729_v27  ;;  %v4191_v8 = vadd.f32 %v1836_v30, %v1730_v28 }
 0x7c1   : > { %v4194_v31 = vmul.f32 0.70710677, %v4189_v2  ;;  %v4197_v32 = vmul.f32 0.70710677, %v4191_v8 }
 0x7c3   : > { %vm1849_vm3 = vcmp.ge.f32.partialorder %v4194_v31, 0.0  ;;  %v1853_v33 = vsub.f32 0.0, %v4194_v31  ;;  %vm1850_vm4 = vcmp.ge.f32.partialorder %v4197_v32, 0.0  ;;  %v1854_v34 = vsub.f32 0.0, %v4197_v32 }
 0x7c5   : > { %v1857_v35 = vsel %vm1849_vm3, %v4194_v31, %v1853_v33  ;;  %v1858_v36 = vsel %vm1850_vm4, %v4197_v32, %v1854_v34  ;;  %v1842_v32 = vmul.f32 0.5, %v4191_v8 }
 0x7c6   : > { %v1861_v37 = vmul.f32 0.3275911, %v1857_v35  ;;  %v1862_v38 = vmul.f32 0.3275911, %v1858_v36  ;;  %v1824_v39 = vpop.f32.mrf.mxu2  ;;  %v1838_v40 = vpop.f32.mrf.mxu3  ;;  %v1965_v7 = vmul.f32 %v1857_v35, %v1857_v35  ;;  %v1966_v4 = vmul.f32 %v1858_v36, %v1858_v36  ;;  %v2869_v35 = vld [vmem:[%s3962_s0 + $0x10] sm:$0xff] }
 0x7c7   : > { %v4209_v41 = vadd.f32 %v1824_v39, %v1729_v27  ;;  %v4211_v42 = vadd.f32 %v1838_v40, %v1730_v28  ;;  %v2877_v36 = vld [vmem:[%s3962_s0 + $0x50] sm:$0xff]  ;;  %2144 = vmatpush.bf16.msrb.mxu0 %v2869_v35 }
 0x7c8   : > { %v1865_v45 = vadd.f32 1.0, %v1861_v37  ;;  %v4215_v46 = vadd.f32 1.0, %v1862_v38  ;;  %v1969_v23 = vsub.f32 0.0, %v1965_v7  ;;  %v1970_v26 = vsub.f32 0.0, %v1966_v4  ;;  %2158 = vmatpush.bf16.msra.mxu1 %v2877_v36 }
 0x7c9   : > { %v4218_v47 = vmul.f32 0.70710677, %v4209_v41  ;;  %v4221_v48 = vmul.f32 0.70710677, %v4211_v42 }
 0x7ca   : > { %3097 = vrcp.f32 %v1865_v45  ;;  %v1878_v13 = vand.u32 2147483647, %v1865_v45  ;;  %v1880_v14 = vand.u32 2147483648, %v1865_v45  ;;  %v1895_v17 = vand.u32 2147483648, %v4215_v46 }
 0x7cb   : > { %3099 = vrcp.f32 %v4215_v46  ;;  %vm1851_vm5 = vcmp.ge.f32.partialorder %v4218_v47, 0.0  ;;  %v1855_v51 = vsub.f32 0.0, %v4218_v47  ;;  %vm1852_vm6 = vcmp.ge.f32.partialorder %v4221_v48, 0.0  ;;  %2145 = vmatpush.bf16.msrb.mxu0 %v2868_v56 }
 0x7cc   : > { %v1856_v53 = vsub.f32 0.0, %v4221_v48  ;;  %v1893_v19 = vand.u32 2147483647, %v4215_v46  ;;  %vm1874_vm9 = vweird.f32 %v1865_v45  ;;  %v1881_v22 = vor.u32 1.1754944e-38, %v1880_v14 }
 0x7cd   : > { %v4233_v54 = vsel %vm1851_vm5, %v4218_v47, %v1855_v51  ;;  %vm1889_vm11 = vweird.f32 %v4215_v46  ;;  %vm1879_vm12 = vcmp.eq.f32.partialorder %v1878_v13, 8.507059e+37  ;;  %v1896_v25 = vor.u32 1.1754944e-38, %v1895_v17 }
 0x7ce   : > { %v1863_v58 = vmul.f32 0.3275911, %v4233_v54  ;;  %v4241_v59 = vsel %vm1852_vm6, %v4221_v48, %v1856_v53  ;;  %vm1894_vm14 = vcmp.eq.f32.partialorder %v1893_v19, 8.507059e+37  ;;  %v1973_v37 = vmul.f32 1.442695, %v1969_v23 }
 0x7cf   : > { %v1864_v0 = vmul.f32 0.3275911, %v4241_v59  ;;  %v1975_v43 = vmul.f32 1.442695, %v1970_v26 }
 0x7d0   : > { %v3098_v57 = vpop.eup %3097  ;;  %v4245_v52 = vadd.f32 1.0, %v1863_v58 }
 0x7d1   : > { %v3100_v60 = vpop.eup %3099  ;;  %v1870_v62 = vmul.f32 %v3098_v57, %v1865_v45  ;;  %v4247_v9 = vadd.f32 1.0, %v1864_v0  ;;  %vm1875_vm7 = vweird.f32 %v3098_v57 }
 0x7d2   : > { %v1885_v5 = vmul.f32 %v3100_v60, %v4215_v46  ;;  %3101 = vrcp.f32 %v4245_v52  ;;  %vm1890_vm8 = vweird.f32 %v3100_v60  ;;  %vm1876_vm10 = vmor %vm1874_vm9, %vm1875_vm7  ;;  %v1908_v46 = vand.u32 2147483647, %v4245_v52 }
 0x7d3   : > { %v1871_v3 = vsub.f32 1.0, %v1870_v62  ;;  %3103 = vrcp.f32 %v4247_v9  ;;  %vm1891_vm13 = vmor %vm1889_vm11, %vm1890_vm8  ;;  %v1910_v49 = vand.u32 2147483648, %v4245_v52  ;;  %v1925_v55 = vand.u32 2147483648, %v4247_v9 }
 0x7d4   : > { %v1886_v15 = vsub.f32 1.0, %v1885_v5  ;;  %v1923_v62 = vand.u32 2147483647, %v4247_v9  ;;  %vm1904_vm1 = vweird.f32 %v4245_v52  ;;  %vm1919_vm7 = vweird.f32 %v4247_v9 }
 0x7d5   : > { %v1872_v16 = vmul.f32 %v3098_v57, %v1871_v3  ;;  %v1967_v3 = vmul.f32 %v4233_v54, %v4233_v54  ;;  %v1911_v4 = vor.u32 1.1754944e-38, %v1910_v49  ;;  %vm1909_vm8 = vcmp.eq.f32.partialorder %v1908_v46, 8.507059e+37 }
 0x7d6   : > { %v1887_v11 = vmul.f32 %v3100_v60, %v1886_v15  ;;  %v1926_v14 = vor.u32 1.1754944e-38, %v1925_v55  ;;  %v2875_v15 = vld [vmem:[%s3962_s0 + $0x40] sm:$0xff]  ;;  %3105 = vpow2.f32 %v1973_v37 }
 0x7d7   : > { %v1873_v20 = vadd.f32 %v3098_v57, %v1872_v16  ;;  %3107 = vpow2.f32 %v1975_v43 }
 0x7d8   : > { %v1888_v63 = vadd.f32 %v3100_v60, %v1887_v11  ;;  %v3102_v6 = vpop.eup %3101 }
 0x7d9   : > { %v1877_v24 = vsel %vm1876_vm10, %v3098_v57, %v1873_v20  ;;  %v3104_v29 = vpop.eup %3103  ;;  %v1900_v34 = vmul.f32 %v3102_v6, %v4245_v52  ;;  %vm1905_vm15 = vweird.f32 %v3102_v6  ;;  %v2876_v57 = vld [vmem:[%s3962_s0 + $0x48] sm:$0xff]  ;;  %v2867_v52 = vld [vmem:[%s3962_s0] sm:$0xff]  ;;  %vm1924_vm10 = vcmp.eq.f32.partialorder %v1923_v62, 8.507059e+37 }
 0x7da   : > { %v4258_v27 = vsel %vm1879_vm12, %v1881_v22, %v1877_v24  ;;  %v1892_v28 = vsel %vm1891_vm13, %v3100_v60, %v1888_v63  ;;  %v1915_v39 = vmul.f32 %v3104_v29, %v4247_v9  ;;  %vm1920_vm0 = vweird.f32 %v3104_v29  ;;  %2159 = vmatpush.bf16.msra.mxu1 %v2876_v57  ;;  %vm1906_vm2 = vmor %vm1904_vm1, %vm1905_vm15  ;;  %2146 = vmatpush.bf16.msrb.mxu0 %v2867_v52 }
 0x7db   : > { %v1929_v30 = vmul.f32 1.0614054, %v4258_v27  ;;  %v4261_v33 = vsel %vm1894_vm14, %v1896_v25, %v1892_v28  ;;  %v1901_v44 = vsub.f32 1.0, %v1900_v34  ;;  %vm1921_vm9 = vmor %vm1919_vm7, %vm1920_vm0  ;;  %v1968_v9 = vmul.f32 %v4241_v59, %v4241_v59 }
 0x7dc   : > { %v1930_v38 = vmul.f32 1.0614054, %v4261_v33  ;;  %v1916_v50 = vsub.f32 1.0, %v1915_v39  ;;  %v1971_v24 = vsub.f32 0.0, %v1967_v3  ;;  %v3106_v35 = vpop.eup %3105 }
 0x7dd   : > { %v1933_v40 = vadd.f32 -1.4531521, %v1929_v30  ;;  %v1902_v53 = vmul.f32 %v3102_v6, %v1901_v44  ;;  %v1972_v28 = vsub.f32 0.0, %v1968_v9  ;;  %v3108_v39 = vpop.eup %3107 }
 0x7de   : > { %v1934_v45 = vadd.f32 -1.4531521, %v1930_v38  ;;  %v1917_v60 = vmul.f32 %v3104_v29, %v1916_v50  ;;  %2160 = vmatpush.bf16.msra.mxu1 %v2875_v15  ;;  %v1977_v37 = vmul.f32 1.442695, %v1971_v24 }
 0x7df   : > { %v1937_v51 = vmul.f32 %v1933_v40, %v4258_v27  ;;  %v1903_v5 = vadd.f32 %v3102_v6, %v1902_v53  ;;  %v1979_v44 = vmul.f32 1.442695, %v1972_v28 }
 0x7e0   : > { %v1938_v58 = vmul.f32 %v1934_v45, %v4261_v33  ;;  %v1918_v10 = vadd.f32 %v3104_v29, %v1917_v60  ;;  %3109 = vpow2.f32 %v1977_v37 }
 0x7e1   : > { %v1941_v0 = vadd.f32 1.4214138, %v1937_v51  ;;  %v1907_v13 = vsel %vm1906_vm2, %v3102_v6, %v1903_v5  ;;  %3111 = vpow2.f32 %v1979_v44 }
 0x7e2   : > { %v1942_v7 = vadd.f32 1.4214138, %v1938_v58  ;;  %v1912_v16 = vsel %vm1909_vm8, %v1911_v4, %v1907_v13  ;;  %v1922_v17 = vsel %vm1921_vm9, %v3104_v29, %v1918_v10 }
 0x7e3   : > { %v1945_v12 = vmul.f32 %v1941_v0, %v4258_v27  ;;  %v1931_v19 = vmul.f32 1.0614054, %v1912_v16  ;;  %v1927_v20 = vsel %vm1924_vm10, %v1926_v14, %v1922_v17  ;;  %v1841_v17 = vmul.f32 0.5, %v4189_v2  ;;  %v3054_v2 = vld [vmem:[%s903_s15] ss:$0 sm:$0xff] }
 0x7e4   : > { %v1946_v54 = vmul.f32 %v1942_v7, %v4261_v33  ;;  %v1932_v18 = vmul.f32 1.0614054, %v1927_v20 }
 0x7e5   : > { %v1949_v11 = vadd.f32 -0.28449672, %v1945_v12  ;;  %v1935_v23 = vadd.f32 -1.4531521, %v1931_v19 }
 0x7e6   : > { %v1950_v21 = vadd.f32 -0.28449672, %v1946_v54  ;;  %v1936_v25 = vadd.f32 -1.4531521, %v1932_v18  ;;  %v3110_v60 = vpop.eup %3109 }
 0x7e7   : > { %v1953_v22 = vmul.f32 %v1949_v11, %v4258_v27  ;;  %v1939_v6 = vmul.f32 %v1935_v23, %v1912_v16  ;;  %v3112_v5 = vpop.eup %3111  ;;  %v1843_v11 = vmul.f32 0.5, %v4209_v41 }
 0x7e8   : > { %v1954_v63 = vmul.f32 %v1950_v21, %v4261_v33  ;;  %v1940_v30 = vmul.f32 %v1936_v25, %v1927_v20 }
 0x7e9   : > { %v1957_v26 = vadd.f32 0.2548296, %v1953_v22  ;;  %v1943_v34 = vadd.f32 1.4214138, %v1939_v6 }
 0x7ea   : > { %v1958_v29 = vadd.f32 0.2548296, %v1954_v63  ;;  %v1944_v38 = vadd.f32 1.4214138, %v1940_v30 }
 0x7eb   : > { %v1961_v59 = vmul.f32 %v1957_v26, %v4258_v27  ;;  %v1947_v43 = vmul.f32 %v1943_v34, %v1912_v16 }
 0x7ec   : > { %v1962_v36 = vmul.f32 %v1958_v29, %v4261_v33  ;;  %v1948_v46 = vmul.f32 %v1944_v38, %v1927_v20 }
 0x7ed   : > { %v1981_v40 = vmul.f32 %v3106_v35, %v1961_v59  ;;  %v1951_v49 = vadd.f32 -0.28449672, %v1947_v43 }
 0x7ee   : > { %v1982_v45 = vmul.f32 %v3108_v39, %v1962_v36  ;;  %v1952_v50 = vadd.f32 -0.28449672, %v1948_v46 }
 0x7ef   : > { %v1985_v51 = vsub.f32 1.0, %v1981_v40  ;;  %v1955_v53 = vmul.f32 %v1951_v49, %v1912_v16 }
 0x7f0   : > { %v1986_v55 = vsub.f32 1.0, %v1982_v45  ;;  %v1956_v27 = vmul.f32 %v1952_v50, %v1927_v20 }
 0x7f1   : > { %v1959_v56 = vadd.f32 0.2548296, %v1955_v53  ;;  %v1989_v58 = vsub.f32 0.0, %v1985_v51 }
 0x7f2   : > { %v1960_v57 = vadd.f32 0.2548296, %v1956_v27  ;;  %v1990_v62 = vsub.f32 0.0, %v1986_v55 }
 0x7f3   : > { %v1963_v33 = vmul.f32 %v1959_v56, %v1912_v16  ;;  %v1993_v4 = vsel %vm1849_vm3, %v1985_v51, %v1989_v58 }
 0x7f4   : > { %v1964_v0 = vmul.f32 %v1960_v57, %v1927_v20  ;;  %v1994_v12 = vsel %vm1850_vm4, %v1986_v55, %v1990_v62  ;;  %v1997_v52 = vadd.f32 1.0, %v1993_v4  ;;  %v1844_v20 = vmul.f32 0.5, %v4211_v42 }
 0x7f5   : > { %v1983_v3 = vmul.f32 %v3110_v60, %v1963_v33  ;;  %v1998_v54 = vadd.f32 1.0, %v1994_v12 }
 0x7f6   : > { %v1984_v7 = vmul.f32 %v3112_v5, %v1964_v0  ;;  %v2001_v21 = vmul.f32 %v1997_v52, %v1841_v17 }
 0x7f7   : > { %v1987_v10 = vsub.f32 1.0, %v1983_v3  ;;  %v2002_v22 = vmul.f32 %v1998_v54, %v1842_v32 }
 0x7f8   : > { %v1988_v13 = vsub.f32 1.0, %v1984_v7 }
 0x7f9   : > { %v1991_v14 = vsub.f32 0.0, %v1987_v10 }
 0x7fa   : > { %v1992_v15 = vsub.f32 0.0, %v1988_v13 }
 0x7fb   : > { %v1995_v16 = vsel %vm1851_vm5, %v1987_v10, %v1991_v14 }
 0x7fc   : > { %v1999_v19 = vadd.f32 1.0, %v1995_v16  ;;  %v1996_v31 = vsel %vm1852_vm6, %v1988_v13, %v1992_v15 }
 0x7fd   : > { %v2000_v9 = vadd.f32 1.0, %v1996_v31 }
 0x7fe   : > { %v2003_v18 = vmul.f32 %v1999_v19, %v1843_v11 }
 0x7ff   : > { %v2004_v23 = vmul.f32 %v2000_v9, %v1844_v20 }
 0x800   : > { %v2005_v47 = vpack.c.bf16 %v2003_v18, %v2001_v21 }
 0x801   : > { %v2006_v63 = vpack.c.bf16 %v2004_v23, %v2002_v22 }
 0x802   : > { %2147 = vmatmul.bf16.vlgmr.msrb.gmra.mxu0 %v2005_v47 }
 0x803   : > { %2161 = vmatmul.bf16.vlgmr.msra.gmra.mxu1 %v2006_v63 }
 0x87f   : > { %v2148_v41 = vpop.f32.mrf.mxu0 }
 0x880   : > { %v2149_v48 = vadd.f32 %v3054_v2, %v2148_v41  ;;  %v2162_v24 = vpop.f32.mrf.mxu1 }
 0x882   : > { %v2163_v8 = vadd.f32 %v2162_v24, %v2149_v48 }
 0x884   : > { %v2167_v42 = vadd.f32 %v2163_v8, %v4126_v61 }
 0x886   : > { %2169 = vst [vmem:[#allocation2] sm:$0xff] %v2167_v42 }
 0x887   : > { %v2150_v25 = vpop.f32.mrf.mxu0 }
 0x888   : > { %v2151_v26 = vadd.f32 %v3054_v2, %v2150_v25  ;;  %v2164_v6 = vpop.f32.mrf.mxu1 }
 0x88a   : > { %v2165_v28 = vadd.f32 %v2164_v6, %v2151_v26  ;;  %2174 = sbr.rel (%p2805_p10) target bundleno = 2194 (0x892), region = 124 }
 0x88c   : > { %v2168_v29 = vadd.f32 %v2165_v28, %v4130_v1 }
 0x88e   : > { %2170 = vst [vmem:[#allocation2 + $0x8] sm:$0xff] %v2168_v29 }
 0x88f   : > { %v2891_v30 = vpack.c.bf16 %v2168_v29, %v2167_v42 }
 0x891   : > { %2892 = vst [vmem:[%s3992_s6] sm:$0xff] %v2891_v30  }
 0x892 PF: > { %s4478_s15 = sld [smem:[#allocation35_spill]]  ;;  %s2192_s8 = sshll.u32 %s3992_s6, 4  ;;  %s2193_s8 = int_to_ptr.vmem [resolvable:$true] %s2192_s8 }
 0x893   : > { %s4479_s18 = sld [smem:[#allocation59_spill]]  ;;  %s2180_s20 = scalar_lea.sflag [#allocation6], %s3914_s14 }
 0x898   : > { %s2883_s5 = sshll.u32 %s4478_s15, 3 }
 0x899   : > { %s4480_s12 = smov %s4479_s18  ;;  %s2191_s22 = scalar_lea.hbm %s4479_s18, %s2883_s5 }
 0x89a   : > { %s2194_s10 = sshll.u32 %s2191_s22, 4  ;;  %s3433_s4 = scalar_lea.hbm %s4480_s12, 16  ;;  %s2195_s10 = int_to_ptr.hbm [resolvable:$true] %s2194_s10 }
 0x89b   : > { %s3427_s13 = sshra.s32 %s2195_s10, 4  ;;  %s3428_s13 = int_to_ptr.hbm [resolvable:$true] %s3427_s13 }
 0x89c   : > { %s3429_s30 = scalar_lea.hbm %s3428_s13, 8  ;;  %p3434_p6 = scmp.lt.s32.totalorder %s3428_s13, %s4480_s12 }
 0x89d   : > { %p3430_p12 = scmp.ne.s32.totalorder %s3428_s13, %s3429_s30  ;;  %p3435_p8 = scmp.lt.s32.totalorder %s3433_s4, %s3429_s30 }
 0x89f   : > { %p3431_p2 = pnand %p3430_p12, %p3834_p0  ;;  %p3436_p1 = por %p3435_p8, %p3434_p6 }
 0x8a1   : > { %p3432_p4 = pneg %p3431_p2 }
 0x8a3   : > { %p3437_p9 = pnand %p3436_p1, %p3432_p4 }
 0x8a5   : > { %3440 = shalt.err (!%p3437_p9)
}
 0x8a6   : > { %s3565_s14 = smov 4  }
 0x8a7   : > { %2913 = dma.vmem_to_hbm [thread:$0]  (%p3834_p0), %s2193_s8, 128, %s2195_s10, %s2180_s20, %s3564_s21, %s3564_s21, %s3565_s14  }
 0x8a8 PF: > { %s4481_s6 = sld [smem:[#allocation31_spill]]  ;;  %p2951_p13 = scmp.ge.s32.totalorder %s3555_s23, 2 }
 0x8aa   : > { %p2947_p11 = pnand %p2951_p13, %p3846_p3 }
 0x8ac   : > { %p2948_p5 = pneg %p2947_p11 }
 0x8ae   : > { %s2209_s27 = sand.u32 1, %s4481_s6  }
 0x8af   : > { %s2210_s11 = scalar_lea.sflag [#allocation6], %s2209_s27 }
 0x8b0   : > { %3510 = dma.done.wait (%p2948_p5), %s2210_s11, 128  }
 0x8b1   : > { %3512 = vsyncadd (%p2948_p5), %s2210_s11, 4294967168  ;;  %s45_s23 = sadd.s32 1, %s3555_s23   ;;  %s4483_s29 = sld [smem:[#allocation29_spill]] }
 0x8b2   : > { %p42_p7 = scmp.ge.s32.totalorder %s45_s23, 6   ;;  %s4484_s30 = sld [smem:[#allocation30_spill]] }
 0x8b3   : > { %s4485_s15 = sld [smem:[#allocation39_spill]] }
 0x8b4   : > { %s4486_s16 = sld [smem:[#allocation32_spill]] }
 0x8b5   : > { %s4487_s17 = sld [smem:[#allocation33_spill]] }
 0x8b6   : > { %s4488_s18 = sld [smem:[#allocation43_spill]]  ;;  %44 = sbr.rel (!%p42_p7) target bundleno = 35 (0x23), region = 250 }
 0x8b7   : > { %s4489_s19 = sld [smem:[#allocation36_spill]] }
 0x8b8   : > { %s4490_s20 = sld [smem:[#allocation37_spill]] }
 0x8b9   : > { %s4491_s21 = sld [smem:[#allocation38_spill]] }
 0x8ba   : > { %s4492_s22 = sld [smem:[#allocation41_spill]] }
 0x8bb   :  { %2216 = vsyncpa [#allocation5], 1 }
 0x8bc   :  { %2218 = vsyncpa [#allocation5 + $0x1], 1 }
 0x8bd   :  { %2219 = vsyncpa [#allocation8], 1 }
 0x8be   :  { %2221 = vsyncpa [#allocation8 + $0x1], 1 }
 0x8bf   :  { %2222 = vsyncpa [#allocation11], 1 }
 0x8c0   :  { %2224 = vsyncpa [#allocation11 + $0x1], 1 }
 0x8c1   :  { %2225 = vsyncpa [#allocation14], 1 }
 0x8c2   :  { %2227 = vsyncpa [#allocation14 + $0x1], 1 }
 0x8c3   :  { %2228 = vsyncpa [#allocation17], 1 }
 0x8c4   :  { %2230 = vsyncpa [#allocation17 + $0x1], 1 }
 0x8c5   :  { %2231 = vsyncpa [#allocation20], 1 }
 0x8c6   :  { %2233 = vsyncpa [#allocation20 + $0x1], 1 }
 0x8c7   :  { %2234 = vsyncpa [#allocation6], 1 }
 0x8c8   :  { %2236 = vsyncpa [#allocation6 + $0x1], 1 }

</bundles_post_ra>
